<compile_context>
chip_gen: v7x
topology: tpu7x:2x2x1
jax: 0.10.0
libtpu: 0.0.40
codegen_flags: <defaults>
</compile_context>

<pallas_src>
import functools

import jax
import jax.numpy as jnp
from jax import lax
from jax.experimental import pallas as pl
from jax.experimental.pallas import tpu as pltpu


# ---------------- Pallas kernels ----------------

def _conv_stats_kernel(col_ref, w_ref, b_ref, out_ref, stat_ref, *,
                       m_valid, tile_m):
    """One MXU matmul per M tile (K merged & padded to 128) + conv bias,
    with per-tile BN statistics (sum, sum of squares) fused in the epilogue."""
    i = pl.program_id(0)

    # (tile_m, Kp) x (Kp, Cp) -> (tile_m, Cp), f32 accumulate on the MXU.
    y = jnp.dot(col_ref[...], w_ref[...], preferred_element_type=jnp.float32)
    y = y + b_ref[...]                       # conv bias, broadcast over rows
    out_ref[...] = y

    # Mask rows that are only M-padding so they don't pollute the statistics.
    row = i * tile_m + lax.broadcasted_iota(jnp.int32, (tile_m, 1), 0)
    yv = jnp.where(row < m_valid, y, 0.0)
    s1 = jnp.sum(yv, axis=0, keepdims=True)          # (1, Cp)
    s2 = jnp.sum(yv * yv, axis=0, keepdims=True)     # (1, Cp)
    stat_ref[...] = jnp.concatenate([s1, s2], axis=0)[None, :, :]   # (1, 2, Cp)


def _bn_relu_kernel(y_ref, s_ref, g_ref, b_ref, o_ref, *, count, eps):
    """BatchNorm (training-mode batch stats, biased var) + ReLU, fused.

    Note: var = E[y^2] - mean^2 single pass; fine at these sizes / f32, a
    shifted two-pass formulation is safer for very large M."""
    y = y_ref[...]
    inv_n = 1.0 / count
    mean = s_ref[0:1, :] * inv_n
    var = s_ref[1:2, :] * inv_n - mean * mean
    scale = g_ref[...] * lax.rsqrt(var + eps)
    shift = b_ref[...] - mean * scale
    o_ref[...] = jnp.maximum(y * scale + shift, 0.0)


# ---------------- wrapper ----------------

_LANES = 128
_VMEM_LIMIT = 32 * 1024 * 1024   # safe on v7x (64 MiB physical) and below


def _round_up(x, m):
    return ((x + m - 1) // m) * m


def conv_block_forward(x, w, bias, gamma, beta, *, eps=1e-5, tile_m=1024):
    """x: (N, Cin, D, H, W) NCDHW (PyTorch convention).  Returns NCDHW."""
    N, Cin, D, H, W = x.shape
    Cout, _, KD, KH, KW = w.shape
    M = N * D * H * W
    K = KD * KH * KW * Cin                    # merged reduction dim (e.g. 108)

    Kp = _round_up(K, _LANES)                 # pad K to full lane width
    Cp = _round_up(Cout, _LANES)              # pad Cout to full lane width
    nm = pl.cdiv(M, tile_m)
    Mp = nm * tile_m

    # ---- glue (plain JAX): NCDHW -> NDHWC, zero-pad, merged-K im2col ----
    x_ndhwc = jnp.transpose(x, (0, 2, 3, 4, 1)).astype(jnp.float32)
    xp = jnp.pad(x_ndhwc, ((0, 0), (1, 1), (1, 1), (1, 1), (0, 0)))
    cols = []
    for kd in range(KD):
        for kh in range(KH):
            for kw in range(KW):
                cols.append(
                    xp[:, kd:kd + D, kh:kh + H, kw:kw + W, :].reshape(M, Cin))
    col = jnp.concatenate(cols, axis=1)                       # (M, K)
    col = jnp.pad(col, ((0, Mp - M), (0, Kp - K)))            # (Mp, Kp)

    # (Cout, Cin, KD, KH, KW) -> (KD, KH, KW, Cin, Cout) -> (K, Cout) -> pad
    w_r = jnp.transpose(w, (2, 3, 4, 1, 0)).reshape(K, Cout).astype(jnp.float32)
    w_r = jnp.pad(w_r, ((0, Kp - K), (0, Cp - Cout)))         # (Kp, Cp)
    b_r = jnp.pad(bias.reshape(1, Cout).astype(jnp.float32),
                  ((0, 0), (0, Cp - Cout)))
    g_r = jnp.pad(gamma.reshape(1, Cout).astype(jnp.float32),
                  ((0, 0), (0, Cp - Cout)))
    beta_r = jnp.pad(beta.reshape(1, Cout).astype(jnp.float32),
                     ((0, 0), (0, Cp - Cout)))

    # ---- kernel 1: conv matmul + bias + fused BN-stat partials ----
    conv_out, stat_part = pl.pallas_call(
        functools.partial(_conv_stats_kernel, m_valid=M, tile_m=tile_m),
        out_shape=(
            jax.ShapeDtypeStruct((Mp, Cp), jnp.float32),
            jax.ShapeDtypeStruct((nm, 2, Cp), jnp.float32),
        ),
        grid_spec=pltpu.PrefetchScalarGridSpec(
            num_scalar_prefetch=0,
            grid=(nm,),
            in_specs=[
                pl.BlockSpec((tile_m, Kp), lambda i: (i, 0)),
                pl.BlockSpec((Kp, Cp), lambda i: (0, 0)),   # whole weight, once
                pl.BlockSpec((1, Cp), lambda i: (0, 0)),
            ],
            out_specs=(
                pl.BlockSpec((tile_m, Cp), lambda i: (i, 0)),
                pl.BlockSpec((1, 2, Cp), lambda i: (i, 0, 0)),
            )),
        compiler_params=pltpu.CompilerParams(
            dimension_semantics=("parallel",),
            vmem_limit_bytes=_VMEM_LIMIT),
    )(col, w_r, b_r)

    # Tiny (nm, 2, Cp) -> (2, Cp) reduction of per-tile partials.
    sums = jnp.sum(stat_part, axis=0)

    # ---- kernel 2: normalize + affine + ReLU (elementwise) ----
    out_flat = pl.pallas_call(
        functools.partial(_bn_relu_kernel, count=float(M), eps=eps),
        out_shape=jax.ShapeDtypeStruct((Mp, Cp), jnp.float32),
        grid_spec=pltpu.PrefetchScalarGridSpec(
            num_scalar_prefetch=0,
            grid=(nm,),
            in_specs=[
                pl.BlockSpec((tile_m, Cp), lambda i: (i, 0)),
                pl.BlockSpec((2, Cp), lambda i: (0, 0)),
                pl.BlockSpec((1, Cp), lambda i: (0, 0)),
                pl.BlockSpec((1, Cp), lambda i: (0, 0)),
            ],
            out_specs=pl.BlockSpec((tile_m, Cp), lambda i: (i, 0))),
        compiler_params=pltpu.CompilerParams(
            dimension_semantics=("parallel",),
            vmem_limit_bytes=_VMEM_LIMIT),
    )(conv_out, sums, g_r, beta_r)

    # glue: slice off M/C padding, (M, Cout) -> (N, D, H, W, Cout) -> NCDHW
    out = out_flat[:M, :Cout].reshape(N, D, H, W, Cout)
    return jnp.transpose(out, (0, 4, 1, 2, 3))


# ---------------- pure-JAX reference (for verification) ----------------

def reference_forward(x, w, bias, gamma, beta, eps=1e-5):
    y = lax.conv_general_dilated(
        x, w, window_strides=(1, 1, 1),
        padding=((1, 1), (1, 1), (1, 1)),
        dimension_numbers=("NCDHW", "OIDHW", "NCDHW"))
    y = y + bias[None, :, None, None, None]
    mean = jnp.mean(y, axis=(0, 2, 3, 4), keepdims=True)
    var = jnp.var(y, axis=(0, 2, 3, 4), keepdims=True)  # biased, BN training mode
    y = (y - mean) / jnp.sqrt(var + eps)
    y = y * gamma[None, :, None, None, None] + beta[None, :, None, None, None]
    return jnp.maximum(y, 0.0)


if __name__ == "__main__":
    N, Cin, Cout, D, H, W = 2, 4, 8, 8, 8, 8
    key = jax.random.PRNGKey(0)
    kx, kw, kb = jax.random.split(key, 3)

    x = jax.random.normal(kx, (N, Cin, D, H, W), dtype=jnp.float32)
    w = jax.random.normal(kw, (Cout, Cin, 3, 3, 3), dtype=jnp.float32) * 0.1
    bias = jax.random.normal(kb, (Cout,), dtype=jnp.float32) * 0.1
    gamma = jnp.ones((Cout,), jnp.float32)    # nn.BatchNorm3d weight init
    beta = jnp.zeros((Cout,), jnp.float32)    # nn.BatchNorm3d bias init

    out = jax.block_until_ready(conv_block_forward(x, w, bias, gamma, beta))
    ref = reference_forward(x, w, bias, gamma, beta)

    assert out.shape == (N, Cout, D, H, W), out.shape
    max_err = float(jnp.max(jnp.abs(out - ref)))
    assert jnp.allclose(out, ref, atol=1e-3, rtol=1e-3), max_err
    print("KERNEL_OK")
</pallas_src>

<mosaic_0001>
module attributes {stable_mosaic.version = 11 : i64} {
  func.func @_conv_stats_kernel(%arg0: i32, %arg1: memref<1024x128xf32, #tpu.memory_space<vmem>>, %arg2: memref<128x128xf32, #tpu.memory_space<vmem>>, %arg3: memref<1x128xf32, #tpu.memory_space<vmem>>, %arg4: memref<1024x128xf32, #tpu.memory_space<vmem>>, %arg5: memref<1x2x128xf32, #tpu.memory_space<vmem>>) attributes {dimension_semantics = [#tpu.dimension_semantics<parallel>], iteration_bounds = array<i64: 1>, scalar_prefetch = 0 : i64, scratch_operands = 0 : i64, tpu.core_type = #tpu.core_type<tc>, window_params = [{transform_indices = @transform_0, window_bounds = array<i64: 1024, 128>}, {pipeline_mode = #tpu.pipeline_mode<synchronous>, transform_indices = @transform_1, window_bounds = array<i64: 128, 128>}, {pipeline_mode = #tpu.pipeline_mode<synchronous>, transform_indices = @transform_2, window_bounds = array<i64: 1, 128>}, {transform_indices = @transform_3, window_bounds = array<i64: 1024, 128>}, {transform_indices = @transform_4, window_bounds = array<i64: 1, 2, 128>}]} {
    %c0 = arith.constant 0 : index
    %c0_0 = arith.constant 0 : index
    %0 = vector.load %arg1[%c0, %c0_0] : memref<1024x128xf32, #tpu.memory_space<vmem>>, vector<1024x128xf32>
    %c0_1 = arith.constant 0 : index
    %c0_2 = arith.constant 0 : index
    %1 = vector.load %arg2[%c0_1, %c0_2] : memref<128x128xf32, #tpu.memory_space<vmem>>, vector<128x128xf32>
    %cst = arith.constant dense<0.000000e+00> : vector<1024x128xf32>
    %2 = tpu.matmul %0, %1, %cst {dimension_numbers = #tpu.dot_dimension_numbers<[1], [0], [0], [1], [0, 0, 1, 1], [], []>} : vector<1024x128xf32>, vector<128x128xf32>, vector<1024x128xf32> -> vector<1024x128xf32>
    %c0_3 = arith.constant 0 : index
    %c0_4 = arith.constant 0 : index
    %3 = vector.load %arg3[%c0_3, %c0_4] : memref<1x128xf32, #tpu.memory_space<vmem>>, vector<1x128xf32>
    %4 = vector.broadcast %3 : vector<1x128xf32> to vector<1024x128xf32>
    %5 = arith.addf %2, %4 : vector<1024x128xf32>
    %c0_5 = arith.constant 0 : index
    %c0_6 = arith.constant 0 : index
    %6 = vector.load %arg4[%c0_5, %c0_6] : memref<1024x128xf32, #tpu.memory_space<vmem>>, vector<1024x128xf32>
    tpu.vector_store %arg4[%c0_5, %c0_6], %5 {strides = array<i32>} : memref<1024x128xf32, #tpu.memory_space<vmem>>, vector<1024x128xf32>,
    %c1024_i32 = arith.constant 1024 : i32
    %7 = arith.muli %arg0, %c1024_i32 : i32
    %8 = tpu.iota {dimensions = array<i32: 0>} : vector<1024x1xi32>
    %9 = vector.broadcast %7 : i32 to vector<1024x1xi32>
    %10 = arith.addi %9, %8 : vector<1024x1xi32>
    %c1024_i32_7 = arith.constant 1024 : i32
    %11 = vector.broadcast %c1024_i32_7 : i32 to vector<1024x1xi32>
    %12 = arith.cmpi slt, %10, %11 : vector<1024x1xi32>
    %cst_8 = arith.constant 0.000000e+00 : f32
    %13 = vector.shape_cast %12 : vector<1024x1xi1> to vector<1024x1xi1>
    %14 = vector.broadcast %13 : vector<1024x1xi1> to vector<1024x128xi1>
    %15 = vector.broadcast %cst_8 : f32 to vector<1024x128xf32>
    %16 = arith.select %14, %5, %15 : vector<1024x128xi1>, vector<1024x128xf32>
    %cst_9 = arith.constant dense<0.000000e+00> : vector<128xf32>
    %17 = vector.multi_reduction <add>, %16, %cst_9 [0] : vector<1024x128xf32> to vector<128xf32>
    %18 = vector.shape_cast %17 : vector<128xf32> to vector<1x128xf32>
    %19 = arith.mulf %16, %16 : vector<1024x128xf32>
    %cst_10 = arith.constant dense<0.000000e+00> : vector<128xf32>
    %20 = vector.multi_reduction <add>, %19, %cst_10 [0] : vector<1024x128xf32> to vector<128xf32>
    %21 = vector.shape_cast %20 : vector<128xf32> to vector<1x128xf32>
    %22 = tpu.concatenate %18, %21 in 0 : vector<1x128xf32>, vector<1x128xf32> -> vector<2x128xf32>
    %23 = vector.shape_cast %22 : vector<2x128xf32> to vector<1x2x128xf32>
    %c0_11 = arith.constant 0 : index
    %c0_12 = arith.constant 0 : index
    %c0_13 = arith.constant 0 : index
    %24 = vector.load %arg5[%c0_11, %c0_12, %c0_13] : memref<1x2x128xf32, #tpu.memory_space<vmem>>, vector<1x2x128xf32>
    tpu.vector_store %arg5[%c0_11, %c0_12, %c0_13], %23 {strides = array<i32>} : memref<1x2x128xf32, #tpu.memory_space<vmem>>, vector<1x2x128xf32>,
    return
  }
  func.func @transform_0(%arg0: i32) -> (i32, i32) {
    %c0_i32 = arith.constant 0 : i32
    %c0_i32_0 = arith.constant 0 : i32
    return %arg0, %c0_i32 : i32, i32
  }
  func.func @transform_1(%arg0: i32) -> (i32, i32) {
    %c0_i32 = arith.constant 0 : i32
    %c0_i32_0 = arith.constant 0 : i32
    %c0_i32_1 = arith.constant 0 : i32
    return %c0_i32, %c0_i32_0 : i32, i32
  }
  func.func @transform_2(%arg0: i32) -> (i32, i32) {
    %c0_i32 = arith.constant 0 : i32
    %c0_i32_0 = arith.constant 0 : i32
    %c0_i32_1 = arith.constant 0 : i32
    return %c0_i32, %c0_i32_0 : i32, i32
  }
  func.func @transform_3(%arg0: i32) -> (i32, i32) {
    %c0_i32 = arith.constant 0 : i32
    %c0_i32_0 = arith.constant 0 : i32
    return %arg0, %c0_i32 : i32, i32
  }
  func.func @transform_4(%arg0: i32) -> (i32, i32, i32) {
    %c0_i32 = arith.constant 0 : i32
    %c0_i32_0 = arith.constant 0 : i32
    %c0_i32_1 = arith.constant 0 : i32
    return %arg0, %c0_i32, %c0_i32_0 : i32, i32, i32
  }
}

</mosaic_0001>

<bundles_post_ra>
// kernel: tpu_custom_call.1
= control target key start
LH: loop header
LB: loop body
LE: loop exit
PB: predicated region body
PF: predicated region fallthrough
CT: control target
= control target key end

     0   :  { %10 = vsyncpa [#allocation3], 0  ;;  %s3321_s0 = inlined_call_operand.hbm [shape: f32[1024,128], index: 0, kind: input, shape index: {}]   ;;  %s3322_s1 = inlined_call_operand.hbm [shape: f32[128,128], index: 1, kind: input, shape index: {}]   ;;  %s3323_s2 = inlined_call_operand.vmem [shape: f32[1,128], index: 2, kind: input, shape index: {}]   ;;  %s3324_s3 = inlined_call_operand.hbm [shape: f32[1024,128], index: 3, kind: output, shape index: {0}]   ;;  %s3325_s4 = inlined_call_operand.hbm [shape: f32[1,2,128], index: 4, kind: output, shape index: {1}]  }
   0x1   :  { %11 = vsyncpa [#allocation6], 0 }
   0x2   :  { %12 = vsyncpa [#allocation4], 0 }
   0x3   :  { %13 = vsyncpa [#allocation9], 0  ;;  %s2755_s15 = smov [#allocation2]   ;;  %s2659_s19 = scalar_lea.hbm %s3321_s0, 16384 }
   0x4   :  { %s19_s16 = sshll.u32 %s2755_s15, 4  ;;  %p2660_p0 = scmp.ne.s32.totalorder %s3321_s0, %s2659_s19  ;;  %s20_s16 = int_to_ptr.vmem [resolvable:$true] %s19_s16 }
   0x5   :  { %p2663_p1 = scmp.lt.u32.totalorder %s2659_s19, %s3321_s0 }
   0x7   :  { %p2665_p2 = pnand %p2663_p1, %p2660_p0 }
   0x9   :  { %2668 = shalt.err (!%p2665_p2)
}
   0xa   :  { %s2669_s24 = scalar_lea.vmem %s20_s16, 16384  ;;  %p2674_p4 = scmp.lt.s32.totalorder %s20_s16, %s20_s16 }
   0xb   :  { %p2670_p3 = scmp.ne.s32.totalorder %s20_s16, %s2669_s24  ;;  %p2675_p5 = scmp.lt.s32.totalorder %s2669_s24, %s2669_s24 }
   0xd   :  { %p2676_p6 = por %p2675_p5, %p2674_p4 }
   0xf   :  { %p2677_p7 = pnand %p2676_p6, %p2670_p3 }
  0x11   :  { %2680 = shalt.err (!%p2677_p7)
}
  0x12   :  { %s2756_s25 = smov 128   ;;  %s2757_s26 = smov 8  }
  0x13   :  { %25 = dma.hbm_to_vmem [thread:$0]  %s3321_s0, 16384, %s20_s16, [#allocation3], %s2756_s25, %s2756_s25, %s2757_s26  }
  0x14   :  { %s2758_s29 = smov [#allocation5]   ;;  %s2681_s7 = scalar_lea.hbm %s3322_s1, 2048 }
  0x15   :  { %s31_s30 = sshll.u32 %s2758_s29, 4  ;;  %p2682_p8 = scmp.ne.s32.totalorder %s3322_s1, %s2681_s7  ;;  %s32_s30 = int_to_ptr.vmem [resolvable:$true] %s31_s30 }
  0x16   :  { %p2685_p9 = scmp.lt.u32.totalorder %s2681_s7, %s3322_s1 }
  0x18   :  { %p2687_p10 = pnand %p2685_p9, %p2682_p8 }
  0x1a   :  { %2690 = shalt.err (!%p2687_p10)
}
  0x1b   :  { %s2691_s12 = scalar_lea.vmem %s32_s30, 2048  ;;  %p2696_p12 = scmp.lt.s32.totalorder %s32_s30, %s32_s30 }
  0x1c   :  { %p2692_p11 = scmp.ne.s32.totalorder %s32_s30, %s2691_s12  ;;  %p2697_p13 = scmp.lt.s32.totalorder %s2691_s12, %s2691_s12 }
  0x1e   :  { %p2698_p0 = por %p2697_p13, %p2696_p12 }
  0x20   :  { %p2699_p1 = pnand %p2698_p0, %p2692_p11 }
  0x22   :  { %2702 = shalt.err (!%p2699_p1)
}
  0x23   :  { %37 = dma.hbm_to_vmem [thread:$0]  %s3322_s1, 2048, %s32_s30, [#allocation6], %s2756_s25, %s2756_s25, %s2757_s26  }
  0x24   :  { %2747 = dma.done.wait [#allocation3], 16384  }
  0x25   :  { %2748 = vsyncadd [#allocation3], 4294950912 }
  0x26   :  { %2749 = dma.done.wait [#allocation6], 2048  }
  0x27   :  { %2750 = vsyncadd [#allocation6], 4294965248  ;;  %v174_v0 = vld [vmem:[#allocation5] sm:$0xff]  ;;  %v175_v1 = vld [vmem:[#allocation5 + $0x8] sm:$0xff] }
  0x28   :  { %v176_v2 = vld [vmem:[#allocation5 + $0x10] sm:$0xff]  ;;  %v2599_v3 = vpack.c.bf16 %v175_v1, %v174_v0  ;;  %v177_v4 = vld [vmem:[#allocation5 + $0x18] sm:$0xff]  ;;  %v178_v6 = vld [vmem:[#allocation5 + $0x20] sm:$0xff] }
  0x29   :  { %v2603_v5 = vpack.c.bf16 %v177_v4, %v176_v2  ;;  %v179_v7 = vld [vmem:[#allocation5 + $0x28] sm:$0xff]  ;;  %v46_v9 = vld [vmem:[#allocation2] sm:$0xff]  ;;  %v180_v10 = vld [vmem:[#allocation5 + $0x30] sm:$0xff] }
  0x2a   :  { %2600 = vmatprep.subr.bf16.mxu0 %v2599_v3  ;;  %2631 = vmatprep.subr.bf16.mxu1 %v2599_v3  ;;  %v2607_v8 = vpack.c.bf16 %v179_v7, %v178_v6  ;;  %v181_v11 = vld [vmem:[#allocation5 + $0x38] sm:$0xff]  ;;  %v182_v13 = vld [vmem:[#allocation5 + $0x40] sm:$0xff]  ;;  %v183_v14 = vld [vmem:[#allocation5 + $0x48] sm:$0xff] }
  0x2b   :  { %2602 = vmatpush3.bf16.msra.mxu0 %v2599_v3  ;;  %2639 = vmatpush3.bf16.msra.mxu1 %v2599_v3  ;;  %v2611_v12 = vpack.c.bf16 %v181_v11, %v180_v10  ;;  %v2615_v15 = vpack.c.bf16 %v183_v14, %v182_v13  ;;  %v184_v16 = vld [vmem:[#allocation5 + $0x50] sm:$0xff]  ;;  %v185_v17 = vld [vmem:[#allocation5 + $0x58] sm:$0xff]  ;;  %v186_v19 = vld [vmem:[#allocation5 + $0x60] sm:$0xff] }
  0x2c   :  { %2604 = vmatprep.subr.bf16.mxu0 %v2603_v5  ;;  %2632 = vmatprep.subr.bf16.mxu1 %v2603_v5  ;;  %v2619_v18 = vpack.c.bf16 %v185_v17, %v184_v16  ;;  %v187_v20 = vld [vmem:[#allocation5 + $0x68] sm:$0xff]  ;;  %v188_v22 = vld [vmem:[#allocation5 + $0x70] sm:$0xff]  ;;  %v189_v23 = vld [vmem:[#allocation5 + $0x78] sm:$0xff] }
  0x2d   :  { %2407 = vmatprep.mubr.f32.mxu0 %v46_v9  ;;  %v2623_v21 = vpack.c.bf16 %v187_v20, %v186_v19  ;;  %v2627_v24 = vpack.c.bf16 %v189_v23, %v188_v22  ;;  %v110_v25 = vld [vmem:[#allocation2 + $0x200] sm:$0xff]  ;;  %v47_v26 = vld [vmem:[#allocation2 + $0x8] sm:$0xff]  ;;  %v48_v28 = vld [vmem:[#allocation2 + $0x10] sm:$0xff] }
  0x2e   :  { %v111_v27 = vld [vmem:[#allocation2 + $0x208] sm:$0xff]  ;;  %2503 = vmatprep.mubr.f32.mxu1 %v110_v25  ;;  %v112_v29 = vld [vmem:[#allocation2 + $0x210] sm:$0xff]  ;;  %v49_v30 = vld [vmem:[#allocation2 + $0x18] sm:$0xff] }
  0x2f   :  { %2606 = vmatpush3.bf16.msra.mxu0 %v2603_v5  ;;  %2640 = vmatpush3.bf16.msra.mxu1 %v2603_v5  ;;  %v113_v31 = vld [vmem:[#allocation2 + $0x218] sm:$0xff]  ;;  %v50_v32 = vld [vmem:[#allocation2 + $0x20] sm:$0xff]  ;;  %v51_v34 = vld [vmem:[#allocation2 + $0x28] sm:$0xff] }
  0x30   :  { %2608 = vmatprep.subr.bf16.mxu0 %v2607_v8  ;;  %2633 = vmatprep.subr.bf16.mxu1 %v2607_v8  ;;  %v114_v33 = vld [vmem:[#allocation2 + $0x220] sm:$0xff]  ;;  %v115_v35 = vld [vmem:[#allocation2 + $0x228] sm:$0xff]  ;;  %v52_v36 = vld [vmem:[#allocation2 + $0x30] sm:$0xff] }
  0x31   :  { %v116_v37 = vld [vmem:[#allocation2 + $0x230] sm:$0xff]  ;;  %v53_v38 = vld [vmem:[#allocation2 + $0x38] sm:$0xff]  ;;  %v54_v40 = vld [vmem:[#allocation2 + $0x40] sm:$0xff] }
  0x32   :  { %v117_v39 = vld [vmem:[#allocation2 + $0x238] sm:$0xff]  ;;  %v118_v41 = vld [vmem:[#allocation2 + $0x240] sm:$0xff]  ;;  %v55_v42 = vld [vmem:[#allocation2 + $0x48] sm:$0xff] }
  0x33   :  { %2610 = vmatpush3.bf16.msra.mxu0 %v2607_v8  ;;  %2641 = vmatpush3.bf16.msra.mxu1 %v2607_v8  ;;  %v119_v43 = vld [vmem:[#allocation2 + $0x248] sm:$0xff]  ;;  %v56_v44 = vld [vmem:[#allocation2 + $0x50] sm:$0xff]  ;;  %v57_v46 = vld [vmem:[#allocation2 + $0x58] sm:$0xff] }
  0x34   :  { %2612 = vmatprep.subr.bf16.mxu0 %v2611_v12  ;;  %2634 = vmatprep.subr.bf16.mxu1 %v2611_v12  ;;  %v120_v45 = vld [vmem:[#allocation2 + $0x250] sm:$0xff]  ;;  %v121_v47 = vld [vmem:[#allocation2 + $0x258] sm:$0xff]  ;;  %v58_v48 = vld [vmem:[#allocation2 + $0x60] sm:$0xff] }
  0x35   :  { %v122_v49 = vld [vmem:[#allocation2 + $0x260] sm:$0xff]  ;;  %v59_v50 = vld [vmem:[#allocation2 + $0x68] sm:$0xff]  ;;  %v60_v52 = vld [vmem:[#allocation2 + $0x70] sm:$0xff] }
  0x36   :  { %v123_v51 = vld [vmem:[#allocation2 + $0x268] sm:$0xff]  ;;  %v124_v53 = vld [vmem:[#allocation2 + $0x270] sm:$0xff]  ;;  %v61_v54 = vld [vmem:[#allocation2 + $0x78] sm:$0xff] }
  0x37   :  { %2614 = vmatpush3.bf16.msra.mxu0 %v2611_v12  ;;  %2642 = vmatpush3.bf16.msra.mxu1 %v2611_v12  ;;  %v125_v55 = vld [vmem:[#allocation2 + $0x278] sm:$0xff]  ;;  %v62_v56 = vld [vmem:[#allocation2 + $0x80] sm:$0xff]  ;;  %v63_v58 = vld [vmem:[#allocation2 + $0x88] sm:$0xff] }
  0x38   :  { %2616 = vmatprep.subr.bf16.mxu0 %v2615_v15  ;;  %2635 = vmatprep.subr.bf16.mxu1 %v2615_v15  ;;  %v126_v57 = vld [vmem:[#allocation2 + $0x280] sm:$0xff]  ;;  %v127_v59 = vld [vmem:[#allocation2 + $0x288] sm:$0xff]  ;;  %v64_v60 = vld [vmem:[#allocation2 + $0x90] sm:$0xff] }
  0x39   :  { %v128_v61 = vld [vmem:[#allocation2 + $0x290] sm:$0xff]  ;;  %v65_v62 = vld [vmem:[#allocation2 + $0x98] sm:$0xff]  ;;  %v66_v0 = vld [vmem:[#allocation2 + $0xa0] sm:$0xff] }
  0x3a   :  { %v129_v63 = vld [vmem:[#allocation2 + $0x298] sm:$0xff]  ;;  %v130_v1 = vld [vmem:[#allocation2 + $0x2a0] sm:$0xff]  ;;  %v67_v2 = vld [vmem:[#allocation2 + $0xa8] sm:$0xff] }
  0x3b   :  { %2618 = vmatpush3.bf16.msra.mxu0 %v2615_v15  ;;  %2643 = vmatpush3.bf16.msra.mxu1 %v2615_v15  ;;  %v131_v3 = vld [vmem:[#allocation2 + $0x2a8] sm:$0xff]  ;;  %v68_v4 = vld [vmem:[#allocation2 + $0xb0] sm:$0xff]  ;;  %v69_v6 = vld [vmem:[#allocation2 + $0xb8] sm:$0xff] }
  0x3c   :  { %2620 = vmatprep.subr.bf16.mxu0 %v2619_v18  ;;  %2636 = vmatprep.subr.bf16.mxu1 %v2619_v18  ;;  %v132_v5 = vld [vmem:[#allocation2 + $0x2b0] sm:$0xff]  ;;  %v133_v7 = vld [vmem:[#allocation2 + $0x2b8] sm:$0xff]  ;;  %v70_v8 = vld [vmem:[#allocation2 + $0xc0] sm:$0xff] }
  0x3d   :  { %v134_v9 = vld [vmem:[#allocation2 + $0x2c0] sm:$0xff]  ;;  %v71_v10 = vld [vmem:[#allocation2 + $0xc8] sm:$0xff]  ;;  %v72_v12 = vld [vmem:[#allocation2 + $0xd0] sm:$0xff] }
  0x3e   :  { %v135_v11 = vld [vmem:[#allocation2 + $0x2c8] sm:$0xff]  ;;  %v136_v13 = vld [vmem:[#allocation2 + $0x2d0] sm:$0xff]  ;;  %v73_v14 = vld [vmem:[#allocation2 + $0xd8] sm:$0xff] }
  0x3f   :  { %2622 = vmatpush3.bf16.msra.mxu0 %v2619_v18  ;;  %2644 = vmatpush3.bf16.msra.mxu1 %v2619_v18  ;;  %v137_v15 = vld [vmem:[#allocation2 + $0x2d8] sm:$0xff]  ;;  %v74_v16 = vld [vmem:[#allocation2 + $0xe0] sm:$0xff]  ;;  %v75_v18 = vld [vmem:[#allocation2 + $0xe8] sm:$0xff] }
  0x40   :  { %2624 = vmatprep.subr.bf16.mxu0 %v2623_v21  ;;  %2637 = vmatprep.subr.bf16.mxu1 %v2623_v21  ;;  %v138_v17 = vld [vmem:[#allocation2 + $0x2e0] sm:$0xff]  ;;  %v139_v19 = vld [vmem:[#allocation2 + $0x2e8] sm:$0xff]  ;;  %v76_v20 = vld [vmem:[#allocation2 + $0xf0] sm:$0xff] }
  0x41   :  { %v77_v22 = vld [vmem:[#allocation2 + $0xf8] sm:$0xff]  ;;  %v142_v25 = vld [vmem:[#allocation2 + $0x300] sm:$0xff] }
  0x42   :  { %v141_v23 = vld [vmem:[#allocation2 + $0x2f8] sm:$0xff] }
  0x43   :  { %2626 = vmatpush3.bf16.msra.mxu0 %v2623_v21  ;;  %2645 = vmatpush3.bf16.msra.mxu1 %v2623_v21  ;;  %v140_v21 = vld [vmem:[#allocation2 + $0x2f0] sm:$0xff] }
  0x44   :  { %2628 = vmatprep.subr.bf16.mxu0 %v2627_v24  ;;  %2638 = vmatprep.subr.bf16.mxu1 %v2627_v24 }
  0x47   :  { %2630 = vmatpush3.bf16.msra.mxu0 %v2627_v24  ;;  %2646 = vmatpush3.bf16.msra.mxu1 %v2627_v24  ;;  %v78_v24 = vld [vmem:[#allocation2 + $0x100] sm:$0xff] }
  0x4a   :  { %2408 = vmatmul.mubr.f32.vlgmr.msra.gmra.mrb[0].mxu0 %v47_v26  ;;  %2504 = vmatmul.mubr.f32.vlgmr.msra.gmra.mrb[0].mxu1 %v111_v27  ;;  %v79_v26 = vld [vmem:[#allocation2 + $0x108] sm:$0xff] }
  0x4b   :  { %2410 = vmatprep.mubr.f32.mxu0 %v48_v28  ;;  %2506 = vmatprep.mubr.f32.mxu1 %v112_v29  ;;  %v143_v27 = vld [vmem:[#allocation2 + $0x308] sm:$0xff]  ;;  %v80_v28 = vld [vmem:[#allocation2 + $0x110] sm:$0xff] }
  0x4c   :  { %v144_v29 = vld [vmem:[#allocation2 + $0x310] sm:$0xff] }
  0x4e   :  { %2411 = vmatmul.mubr.f32.gmra.mrb[2].mxu0 %v49_v30  ;;  %2507 = vmatmul.mubr.f32.gmra.mrb[2].mxu1 %v113_v31  ;;  %v81_v30 = vld [vmem:[#allocation2 + $0x118] sm:$0xff] }
  0x4f   :  { %2413 = vmatprep.mubr.f32.mxu0 %v50_v32  ;;  %2509 = vmatprep.mubr.f32.mxu1 %v114_v33  ;;  %v145_v31 = vld [vmem:[#allocation2 + $0x318] sm:$0xff]  ;;  %v82_v32 = vld [vmem:[#allocation2 + $0x120] sm:$0xff] }
  0x50   :  { %v146_v33 = vld [vmem:[#allocation2 + $0x320] sm:$0xff] }
  0x52   :  { %2414 = vmatmul.mubr.f32.gmra.mrb[4].mxu0 %v51_v34  ;;  %2510 = vmatmul.mubr.f32.gmra.mrb[4].mxu1 %v115_v35  ;;  %v83_v34 = vld [vmem:[#allocation2 + $0x128] sm:$0xff] }
  0x53   :  { %2416 = vmatprep.mubr.f32.mxu0 %v52_v36  ;;  %2512 = vmatprep.mubr.f32.mxu1 %v116_v37  ;;  %v147_v35 = vld [vmem:[#allocation2 + $0x328] sm:$0xff]  ;;  %v84_v36 = vld [vmem:[#allocation2 + $0x130] sm:$0xff] }
  0x54   :  { %v148_v37 = vld [vmem:[#allocation2 + $0x330] sm:$0xff] }
  0x56   :  { %2417 = vmatmul.mubr.f32.gmra.mrb[6].mxu0 %v53_v38  ;;  %2513 = vmatmul.mubr.f32.gmra.mrb[6].mxu1 %v117_v39  ;;  %v85_v38 = vld [vmem:[#allocation2 + $0x138] sm:$0xff] }
  0x57   :  { %2419 = vmatprep.mubr.f32.mxu0 %v54_v40  ;;  %2515 = vmatprep.mubr.f32.mxu1 %v118_v41  ;;  %v149_v39 = vld [vmem:[#allocation2 + $0x338] sm:$0xff]  ;;  %v86_v40 = vld [vmem:[#allocation2 + $0x140] sm:$0xff] }
  0x58   :  { %v150_v41 = vld [vmem:[#allocation2 + $0x340] sm:$0xff] }
  0x5a   :  { %2420 = vmatmul.mubr.f32.gmra.mrb[8].mxu0 %v55_v42  ;;  %2516 = vmatmul.mubr.f32.gmra.mrb[8].mxu1 %v119_v43  ;;  %v87_v42 = vld [vmem:[#allocation2 + $0x148] sm:$0xff] }
  0x5b   :  { %2422 = vmatprep.mubr.f32.mxu0 %v56_v44  ;;  %2518 = vmatprep.mubr.f32.mxu1 %v120_v45  ;;  %v151_v43 = vld [vmem:[#allocation2 + $0x348] sm:$0xff]  ;;  %v88_v44 = vld [vmem:[#allocation2 + $0x150] sm:$0xff] }
  0x5c   :  { %v152_v45 = vld [vmem:[#allocation2 + $0x350] sm:$0xff] }
  0x5e   :  { %2423 = vmatmul.mubr.f32.gmra.mrb[10].mxu0 %v57_v46  ;;  %2519 = vmatmul.mubr.f32.gmra.mrb[10].mxu1 %v121_v47  ;;  %v89_v46 = vld [vmem:[#allocation2 + $0x158] sm:$0xff]  ;;  %v90_v47 = vld [vmem:[#allocation2 + $0x160] sm:$0xff] }
  0x5f   :  { %2425 = vmatprep.mubr.f32.mxu0 %v58_v48  ;;  %2521 = vmatprep.mubr.f32.mxu1 %v122_v49  ;;  %v153_v48 = vld [vmem:[#allocation2 + $0x358] sm:$0xff]  ;;  %v91_v49 = vld [vmem:[#allocation2 + $0x168] sm:$0xff] }
  0x62   :  { %2426 = vmatmul.mubr.f32.gmra.mrb[12].mxu0 %v59_v50  ;;  %2522 = vmatmul.mubr.f32.gmra.mrb[12].mxu1 %v123_v51  ;;  %v154_v50 = vld [vmem:[#allocation2 + $0x360] sm:$0xff]  ;;  %v92_v51 = vld [vmem:[#allocation2 + $0x170] sm:$0xff] }
  0x63   :  { %2428 = vmatprep.mubr.f32.mxu0 %v60_v52  ;;  %2524 = vmatprep.mubr.f32.mxu1 %v124_v53  ;;  %v155_v52 = vld [vmem:[#allocation2 + $0x368] sm:$0xff]  ;;  %v93_v53 = vld [vmem:[#allocation2 + $0x178] sm:$0xff] }
  0x66   :  { %2429 = vmatmul.mubr.f32.gmra.mrb[14].mxu0 %v61_v54  ;;  %2525 = vmatmul.mubr.f32.gmra.mrb[14].mxu1 %v125_v55  ;;  %v156_v54 = vld [vmem:[#allocation2 + $0x370] sm:$0xff]  ;;  %v94_v55 = vld [vmem:[#allocation2 + $0x180] sm:$0xff] }
  0x67   :  { %2431 = vmatprep.mubr.f32.mxu0 %v62_v56  ;;  %2527 = vmatprep.mubr.f32.mxu1 %v126_v57  ;;  %v157_v56 = vld [vmem:[#allocation2 + $0x378] sm:$0xff]  ;;  %v95_v57 = vld [vmem:[#allocation2 + $0x188] sm:$0xff] }
  0x6a   :  { %2432 = vmatmul.mubr.f32.gmra.mrb[16].mxu0 %v63_v58  ;;  %2528 = vmatmul.mubr.f32.gmra.mrb[16].mxu1 %v127_v59  ;;  %v158_v58 = vld [vmem:[#allocation2 + $0x380] sm:$0xff]  ;;  %v96_v59 = vld [vmem:[#allocation2 + $0x190] sm:$0xff] }
  0x6b   :  { %2434 = vmatprep.mubr.f32.mxu0 %v64_v60  ;;  %2530 = vmatprep.mubr.f32.mxu1 %v128_v61  ;;  %v159_v60 = vld [vmem:[#allocation2 + $0x388] sm:$0xff]  ;;  %v97_v61 = vld [vmem:[#allocation2 + $0x198] sm:$0xff] }
  0x6e   :  { %2435 = vmatmul.mubr.f32.gmra.mrb[18].mxu0 %v65_v62  ;;  %2531 = vmatmul.mubr.f32.gmra.mrb[18].mxu1 %v129_v63  ;;  %v160_v62 = vld [vmem:[#allocation2 + $0x390] sm:$0xff]  ;;  %v98_v63 = vld [vmem:[#allocation2 + $0x1a0] sm:$0xff] }
  0x6f   :  { %2437 = vmatprep.mubr.f32.mxu0 %v66_v0  ;;  %2533 = vmatprep.mubr.f32.mxu1 %v130_v1  ;;  %v161_v0 = vld [vmem:[#allocation2 + $0x398] sm:$0xff]  ;;  %v99_v1 = vld [vmem:[#allocation2 + $0x1a8] sm:$0xff] }
  0x72   :  { %2438 = vmatmul.mubr.f32.gmra.mrb[20].mxu0 %v67_v2  ;;  %2534 = vmatmul.mubr.f32.gmra.mrb[20].mxu1 %v131_v3  ;;  %v162_v2 = vld [vmem:[#allocation2 + $0x3a0] sm:$0xff]  ;;  %v100_v3 = vld [vmem:[#allocation2 + $0x1b0] sm:$0xff] }
  0x73   :  { %2440 = vmatprep.mubr.f32.mxu0 %v68_v4  ;;  %2536 = vmatprep.mubr.f32.mxu1 %v132_v5  ;;  %v163_v4 = vld [vmem:[#allocation2 + $0x3a8] sm:$0xff]  ;;  %v101_v5 = vld [vmem:[#allocation2 + $0x1b8] sm:$0xff] }
  0x76   :  { %2441 = vmatmul.mubr.f32.gmra.mrb[22].mxu0 %v69_v6  ;;  %2537 = vmatmul.mubr.f32.gmra.mrb[22].mxu1 %v133_v7  ;;  %v164_v6 = vld [vmem:[#allocation2 + $0x3b0] sm:$0xff]  ;;  %v102_v7 = vld [vmem:[#allocation2 + $0x1c0] sm:$0xff] }
  0x77   :  { %2443 = vmatprep.mubr.f32.mxu0 %v70_v8  ;;  %2539 = vmatprep.mubr.f32.mxu1 %v134_v9  ;;  %v165_v8 = vld [vmem:[#allocation2 + $0x3b8] sm:$0xff]  ;;  %v103_v9 = vld [vmem:[#allocation2 + $0x1c8] sm:$0xff] }
  0x7a   :  { %2444 = vmatmul.mubr.f32.gmra.mrb[24].mxu0 %v71_v10  ;;  %2540 = vmatmul.mubr.f32.gmra.mrb[24].mxu1 %v135_v11  ;;  %v166_v10 = vld [vmem:[#allocation2 + $0x3c0] sm:$0xff]  ;;  %v104_v11 = vld [vmem:[#allocation2 + $0x1d0] sm:$0xff] }
  0x7b   :  { %2446 = vmatprep.mubr.f32.mxu0 %v72_v12  ;;  %2542 = vmatprep.mubr.f32.mxu1 %v136_v13  ;;  %v167_v12 = vld [vmem:[#allocation2 + $0x3c8] sm:$0xff]  ;;  %v105_v13 = vld [vmem:[#allocation2 + $0x1d8] sm:$0xff] }
  0x7e   :  { %2447 = vmatmul.mubr.f32.gmra.mrb[26].mxu0 %v73_v14  ;;  %2543 = vmatmul.mubr.f32.gmra.mrb[26].mxu1 %v137_v15  ;;  %v168_v14 = vld [vmem:[#allocation2 + $0x3d0] sm:$0xff]  ;;  %v106_v15 = vld [vmem:[#allocation2 + $0x1e0] sm:$0xff] }
  0x7f   :  { %2449 = vmatprep.mubr.f32.mxu0 %v74_v16  ;;  %2545 = vmatprep.mubr.f32.mxu1 %v138_v17  ;;  %v169_v16 = vld [vmem:[#allocation2 + $0x3d8] sm:$0xff]  ;;  %v107_v17 = vld [vmem:[#allocation2 + $0x1e8] sm:$0xff] }
  0x82   :  { %2450 = vmatmul.mubr.f32.gmra.mrb[28].mxu0 %v75_v18  ;;  %2546 = vmatmul.mubr.f32.gmra.mrb[28].mxu1 %v139_v19  ;;  %v170_v18 = vld [vmem:[#allocation2 + $0x3e0] sm:$0xff]  ;;  %v108_v19 = vld [vmem:[#allocation2 + $0x1f0] sm:$0xff] }
  0x83   :  { %2452 = vmatprep.mubr.f32.mxu0 %v76_v20  ;;  %2548 = vmatprep.mubr.f32.mxu1 %v140_v21  ;;  %v171_v20 = vld [vmem:[#allocation2 + $0x3e8] sm:$0xff]  ;;  %v109_v21 = vld [vmem:[#allocation2 + $0x1f8] sm:$0xff] }
  0x86   :  { %2453 = vmatmul.mubr.f32.gmra.mrb[30].mxu0 %v77_v22  ;;  %2549 = vmatmul.mubr.f32.gmra.mrb[30].mxu1 %v141_v23  ;;  %v172_v22 = vld [vmem:[#allocation2 + $0x3f0] sm:$0xff]  ;;  %v173_v23 = vld [vmem:[#allocation2 + $0x3f8] sm:$0xff] }
  0x87   :  { %2455 = vmatprep.mubr.f32.mxu0 %v78_v24  ;;  %2551 = vmatprep.mubr.f32.mxu1 %v142_v25  ;;  %v2819_v24 = vld [vmem:[%s3323_s2] ss:$0 sm:$0xff] }
  0x8a   :  { %2456 = vmatmul.mubr.f32.gmra.mrb[32].mxu0 %v79_v26  ;;  %2552 = vmatmul.mubr.f32.gmra.mrb[32].mxu1 %v143_v27 }
  0x8b   :  { %2458 = vmatprep.mubr.f32.mxu0 %v80_v28  ;;  %2554 = vmatprep.mubr.f32.mxu1 %v144_v29 }
  0x8e   :  { %2459 = vmatmul.mubr.f32.gmra.mrb[34].mxu0 %v81_v30  ;;  %2555 = vmatmul.mubr.f32.gmra.mrb[34].mxu1 %v145_v31 }
  0x8f   :  { %2461 = vmatprep.mubr.f32.mxu0 %v82_v32  ;;  %2557 = vmatprep.mubr.f32.mxu1 %v146_v33 }
  0x92   :  { %2462 = vmatmul.mubr.f32.gmra.mrb[36].mxu0 %v83_v34  ;;  %2558 = vmatmul.mubr.f32.gmra.mrb[36].mxu1 %v147_v35 }
  0x93   :  { %2464 = vmatprep.mubr.f32.mxu0 %v84_v36  ;;  %2560 = vmatprep.mubr.f32.mxu1 %v148_v37 }
  0x96   :  { %2465 = vmatmul.mubr.f32.gmra.mrb[38].mxu0 %v85_v38  ;;  %2561 = vmatmul.mubr.f32.gmra.mrb[38].mxu1 %v149_v39 }
  0x97   :  { %2467 = vmatprep.mubr.f32.mxu0 %v86_v40  ;;  %2563 = vmatprep.mubr.f32.mxu1 %v150_v41 }
  0x9a   :  { %2468 = vmatmul.mubr.f32.gmra.mrb[40].mxu0 %v87_v42  ;;  %2564 = vmatmul.mubr.f32.gmra.mrb[40].mxu1 %v151_v43 }
  0x9b   :  { %2470 = vmatprep.mubr.f32.mxu0 %v88_v44  ;;  %2566 = vmatprep.mubr.f32.mxu1 %v152_v45 }
  0x9e   :  { %2471 = vmatmul.mubr.f32.gmra.mrb[42].mxu0 %v89_v46  ;;  %2567 = vmatmul.mubr.f32.gmra.mrb[42].mxu1 %v153_v48 }
  0x9f   :  { %2473 = vmatprep.mubr.f32.mxu0 %v90_v47  ;;  %2569 = vmatprep.mubr.f32.mxu1 %v154_v50 }
  0xa2   :  { %2474 = vmatmul.mubr.f32.gmra.mrb[44].mxu0 %v91_v49  ;;  %2570 = vmatmul.mubr.f32.gmra.mrb[44].mxu1 %v155_v52 }
  0xa3   :  { %2476 = vmatprep.mubr.f32.mxu0 %v92_v51  ;;  %2572 = vmatprep.mubr.f32.mxu1 %v156_v54 }
  0xa6   :  { %2477 = vmatmul.mubr.f32.gmra.mrb[46].mxu0 %v93_v53  ;;  %2573 = vmatmul.mubr.f32.gmra.mrb[46].mxu1 %v157_v56 }
  0xa7   :  { %2479 = vmatprep.mubr.f32.mxu0 %v94_v55  ;;  %2575 = vmatprep.mubr.f32.mxu1 %v158_v58 }
  0xaa   :  { %2480 = vmatmul.mubr.f32.gmra.mrb[48].mxu0 %v95_v57  ;;  %2576 = vmatmul.mubr.f32.gmra.mrb[48].mxu1 %v159_v60 }
  0xab   :  { %2482 = vmatprep.mubr.f32.mxu0 %v96_v59  ;;  %2578 = vmatprep.mubr.f32.mxu1 %v160_v62 }
  0xae   :  { %2483 = vmatmul.mubr.f32.gmra.mrb[50].mxu0 %v97_v61  ;;  %2579 = vmatmul.mubr.f32.gmra.mrb[50].mxu1 %v161_v0 }
  0xaf   :  { %2485 = vmatprep.mubr.f32.mxu0 %v98_v63  ;;  %2581 = vmatprep.mubr.f32.mxu1 %v162_v2 }
  0xb2   :  { %2486 = vmatmul.mubr.f32.gmra.mrb[52].mxu0 %v99_v1  ;;  %2582 = vmatmul.mubr.f32.gmra.mrb[52].mxu1 %v163_v4 }
  0xb3   :  { %2488 = vmatprep.mubr.f32.mxu0 %v100_v3  ;;  %2584 = vmatprep.mubr.f32.mxu1 %v164_v6 }
  0xb6   :  { %2489 = vmatmul.mubr.f32.gmra.mrb[54].mxu0 %v101_v5  ;;  %2585 = vmatmul.mubr.f32.gmra.mrb[54].mxu1 %v165_v8 }
  0xb7   :  { %2491 = vmatprep.mubr.f32.mxu0 %v102_v7  ;;  %2587 = vmatprep.mubr.f32.mxu1 %v166_v10 }
  0xba   :  { %2492 = vmatmul.mubr.f32.gmra.mrb[56].mxu0 %v103_v9  ;;  %2588 = vmatmul.mubr.f32.gmra.mrb[56].mxu1 %v167_v12 }
  0xbb   :  { %2494 = vmatprep.mubr.f32.mxu0 %v104_v11  ;;  %2590 = vmatprep.mubr.f32.mxu1 %v168_v14 }
  0xbe   :  { %2495 = vmatmul.mubr.f32.gmra.mrb[58].mxu0 %v105_v13  ;;  %2591 = vmatmul.mubr.f32.gmra.mrb[58].mxu1 %v169_v16 }
  0xbf   :  { %2497 = vmatprep.mubr.f32.mxu0 %v106_v15  ;;  %2593 = vmatprep.mubr.f32.mxu1 %v170_v18 }
  0xc2   :  { %2498 = vmatmul.mubr.f32.gmra.mrb[60].mxu0 %v107_v17  ;;  %2594 = vmatmul.mubr.f32.gmra.mrb[60].mxu1 %v171_v20 }
  0xc3   :  { %2500 = vmatprep.mubr.f32.mxu0 %v108_v19  ;;  %2596 = vmatprep.mubr.f32.mxu1 %v172_v22 }
  0xc6   :  { %2501 = vmatmul.mubr.f32.gmra.mrb[62].mxu0 %v109_v21  ;;  %2597 = vmatmul.mubr.f32.gmra.mrb[62].mxu1 %v173_v23 }
 0x11d   :  { %v2409_v25 = vpop.f32.mrb[0].mxu0  ;;  %v2505_v26 = vpop.f32.mrb[0].mxu1 }
 0x11e   :  { %v269_v27 = vadd.f32 %v2409_v25, %v2819_v24  ;;  %v263_v28 = vpop.f32.mrb[1].mxu0  ;;  %v589_v29 = vadd.f32 %v2505_v26, %v2819_v24  ;;  %v583_v30 = vpop.f32.mrb[1].mxu1 }
 0x11f   :  { %v264_v31 = vadd.f32 %v2819_v24, %v263_v28  ;;  %v584_v32 = vadd.f32 %v2819_v24, %v583_v30 }
 0x120   :  { %903 = vst [vmem:[#allocation7 + $0x8] sm:$0xff] %v269_v27  ;;  %v1935_v33 = vmul.f32 %v269_v27, %v269_v27  ;;  %967 = vst [vmem:[#allocation7 + $0x208] sm:$0xff] %v589_v29 }
 0x121   :  { %902 = vst [vmem:[#allocation7] sm:$0xff] %v264_v31  ;;  %v1801_v34 = vadd.f32 %v269_v27, %v264_v31  ;;  %v1934_v35 = vmul.f32 %v264_v31, %v264_v31  ;;  %v2412_v36 = vpop.f32.mrb[2].mxu0  ;;  %966 = vst [vmem:[#allocation7 + $0x200] sm:$0xff] %v584_v32  ;;  %v2508_v37 = vpop.f32.mrb[2].mxu1 }
 0x122   :  { %v279_v38 = vadd.f32 %v2412_v36, %v2819_v24  ;;  %v273_v39 = vpop.f32.mrb[3].mxu0  ;;  %v599_v40 = vadd.f32 %v2508_v37, %v2819_v24  ;;  %v593_v41 = vpop.f32.mrb[3].mxu1 }
 0x123   :  { %v2062_v42 = vadd.f32 %v1935_v33, %v1934_v35  ;;  %v274_v43 = vadd.f32 %v2819_v24, %v273_v39  ;;  %v594_v44 = vadd.f32 %v2819_v24, %v593_v41 }
 0x124   :  { %905 = vst [vmem:[#allocation7 + $0x18] sm:$0xff] %v279_v38  ;;  %969 = vst [vmem:[#allocation7 + $0x218] sm:$0xff] %v599_v40  ;;  %v1937_v49 = vmul.f32 %v279_v38, %v279_v38 }
 0x125   :  { %904 = vst [vmem:[#allocation7 + $0x10] sm:$0xff] %v274_v43  ;;  %v1802_v45 = vadd.f32 %v1801_v34, %v274_v43  ;;  %v1936_v46 = vmul.f32 %v274_v43, %v274_v43  ;;  %v2415_v47 = vpop.f32.mrb[4].mxu0  ;;  %968 = vst [vmem:[#allocation7 + $0x210] sm:$0xff] %v594_v44  ;;  %v2511_v48 = vpop.f32.mrb[4].mxu1 }
 0x126   :  { %v289_v50 = vadd.f32 %v2415_v47, %v2819_v24  ;;  %v283_v51 = vpop.f32.mrb[5].mxu0  ;;  %v2831_v52 = vadd.f32 %v2511_v48, %v2819_v24  ;;  %v603_v53 = vpop.f32.mrb[5].mxu1 }
 0x127   :  { %v1803_v54 = vadd.f32 %v1802_v45, %v279_v38  ;;  %v2063_v55 = vadd.f32 %v2062_v42, %v1936_v46  ;;  %v284_v56 = vadd.f32 %v2819_v24, %v283_v51  ;;  %v604_v57 = vadd.f32 %v2819_v24, %v603_v53 }
 0x128   :  { %907 = vst [vmem:[#allocation7 + $0x28] sm:$0xff] %v289_v50  ;;  %971 = vst [vmem:[#allocation7 + $0x228] sm:$0xff] %v2831_v52  ;;  %v1939_v63 = vmul.f32 %v289_v50, %v289_v50 }
 0x129   :  { %v2064_v58 = vadd.f32 %v2063_v55, %v1937_v49  ;;  %906 = vst [vmem:[#allocation7 + $0x20] sm:$0xff] %v284_v56  ;;  %v1804_v59 = vadd.f32 %v1803_v54, %v284_v56  ;;  %v1938_v60 = vmul.f32 %v284_v56, %v284_v56  ;;  %v2418_v61 = vpop.f32.mrb[6].mxu0  ;;  %970 = vst [vmem:[#allocation7 + $0x220] sm:$0xff] %v604_v57  ;;  %v2514_v62 = vpop.f32.mrb[6].mxu1 }
 0x12a   :  { %v299_v0 = vadd.f32 %v2418_v61, %v2819_v24  ;;  %v293_v1 = vpop.f32.mrb[7].mxu0  ;;  %v2838_v2 = vadd.f32 %v2514_v62, %v2819_v24  ;;  %v613_v3 = vpop.f32.mrb[7].mxu1 }
 0x12b   :  { %v1805_v4 = vadd.f32 %v1804_v59, %v289_v50  ;;  %v2065_v5 = vadd.f32 %v2064_v58, %v1938_v60  ;;  %v294_v6 = vadd.f32 %v2819_v24, %v293_v1  ;;  %v2842_v7 = vadd.f32 %v2819_v24, %v613_v3 }
 0x12c   :  { %909 = vst [vmem:[#allocation7 + $0x38] sm:$0xff] %v299_v0  ;;  %973 = vst [vmem:[#allocation7 + $0x238] sm:$0xff] %v2838_v2  ;;  %v1941_v13 = vmul.f32 %v299_v0, %v299_v0 }
 0x12d   :  { %v2066_v8 = vadd.f32 %v2065_v5, %v1939_v63  ;;  %908 = vst [vmem:[#allocation7 + $0x30] sm:$0xff] %v294_v6  ;;  %v1806_v9 = vadd.f32 %v1805_v4, %v294_v6  ;;  %v1940_v10 = vmul.f32 %v294_v6, %v294_v6  ;;  %v2421_v11 = vpop.f32.mrb[8].mxu0  ;;  %972 = vst [vmem:[#allocation7 + $0x230] sm:$0xff] %v2842_v7  ;;  %v2517_v12 = vpop.f32.mrb[8].mxu1 }
 0x12e   :  { %v309_v14 = vadd.f32 %v2421_v11, %v2819_v24  ;;  %v303_v15 = vpop.f32.mrb[9].mxu0  ;;  %v2848_v16 = vadd.f32 %v2517_v12, %v2819_v24  ;;  %v623_v17 = vpop.f32.mrb[9].mxu1 }
 0x12f   :  { %v1807_v18 = vadd.f32 %v1806_v9, %v299_v0  ;;  %v2067_v19 = vadd.f32 %v2066_v8, %v1940_v10  ;;  %v304_v20 = vadd.f32 %v2819_v24, %v303_v15  ;;  %v2852_v21 = vadd.f32 %v2819_v24, %v623_v17 }
 0x130   :  { %911 = vst [vmem:[#allocation7 + $0x48] sm:$0xff] %v309_v14  ;;  %975 = vst [vmem:[#allocation7 + $0x248] sm:$0xff] %v2848_v16  ;;  %v1943_v28 = vmul.f32 %v309_v14, %v309_v14 }
 0x131   :  { %v2068_v22 = vadd.f32 %v2067_v19, %v1941_v13  ;;  %910 = vst [vmem:[#allocation7 + $0x40] sm:$0xff] %v304_v20  ;;  %v1808_v23 = vadd.f32 %v1807_v18, %v304_v20  ;;  %v1942_v25 = vmul.f32 %v304_v20, %v304_v20  ;;  %v2424_v26 = vpop.f32.mrb[10].mxu0  ;;  %974 = vst [vmem:[#allocation7 + $0x240] sm:$0xff] %v2852_v21  ;;  %v2520_v27 = vpop.f32.mrb[10].mxu1 }
 0x132   :  { %v319_v29 = vadd.f32 %v2424_v26, %v2819_v24  ;;  %v313_v30 = vpop.f32.mrb[11].mxu0  ;;  %v2858_v31 = vadd.f32 %v2520_v27, %v2819_v24  ;;  %v633_v32 = vpop.f32.mrb[11].mxu1 }
 0x133   :  { %v1809_v33 = vadd.f32 %v1808_v23, %v309_v14  ;;  %v2069_v34 = vadd.f32 %v2068_v22, %v1942_v25  ;;  %v314_v35 = vadd.f32 %v2819_v24, %v313_v30  ;;  %v2862_v36 = vadd.f32 %v2819_v24, %v633_v32 }
 0x134   :  { %913 = vst [vmem:[#allocation7 + $0x58] sm:$0xff] %v319_v29  ;;  %977 = vst [vmem:[#allocation7 + $0x258] sm:$0xff] %v2858_v31  ;;  %v1945_v42 = vmul.f32 %v319_v29, %v319_v29 }
 0x135   :  { %v2070_v37 = vadd.f32 %v2069_v34, %v1943_v28  ;;  %912 = vst [vmem:[#allocation7 + $0x50] sm:$0xff] %v314_v35  ;;  %v1810_v38 = vadd.f32 %v1809_v33, %v314_v35  ;;  %v1944_v39 = vmul.f32 %v314_v35, %v314_v35  ;;  %v2427_v40 = vpop.f32.mrb[12].mxu0  ;;  %976 = vst [vmem:[#allocation7 + $0x250] sm:$0xff] %v2862_v36  ;;  %v2523_v41 = vpop.f32.mrb[12].mxu1 }
 0x136   :  { %v329_v43 = vadd.f32 %v2427_v40, %v2819_v24  ;;  %v323_v44 = vpop.f32.mrb[13].mxu0  ;;  %v2868_v45 = vadd.f32 %v2523_v41, %v2819_v24  ;;  %v643_v46 = vpop.f32.mrb[13].mxu1 }
 0x137   :  { %v1811_v47 = vadd.f32 %v1810_v38, %v319_v29  ;;  %v2071_v48 = vadd.f32 %v2070_v37, %v1944_v39  ;;  %v324_v49 = vadd.f32 %v2819_v24, %v323_v44  ;;  %v2872_v50 = vadd.f32 %v2819_v24, %v643_v46 }
 0x138   :  { %915 = vst [vmem:[#allocation7 + $0x68] sm:$0xff] %v329_v43  ;;  %979 = vst [vmem:[#allocation7 + $0x268] sm:$0xff] %v2868_v45  ;;  %v1947_v57 = vmul.f32 %v329_v43, %v329_v43 }
 0x139   :  { %v2072_v51 = vadd.f32 %v2071_v48, %v1945_v42  ;;  %914 = vst [vmem:[#allocation7 + $0x60] sm:$0xff] %v324_v49  ;;  %v1812_v53 = vadd.f32 %v1811_v47, %v324_v49  ;;  %v1946_v54 = vmul.f32 %v324_v49, %v324_v49  ;;  %v2430_v55 = vpop.f32.mrb[14].mxu0  ;;  %978 = vst [vmem:[#allocation7 + $0x260] sm:$0xff] %v2872_v50  ;;  %v2526_v56 = vpop.f32.mrb[14].mxu1 }
 0x13a   :  { %v339_v58 = vadd.f32 %v2430_v55, %v2819_v24  ;;  %v333_v59 = vpop.f32.mrb[15].mxu0  ;;  %v2878_v60 = vadd.f32 %v2526_v56, %v2819_v24  ;;  %v653_v61 = vpop.f32.mrb[15].mxu1 }
 0x13b   :  { %v1813_v62 = vadd.f32 %v1812_v53, %v329_v43  ;;  %v2073_v63 = vadd.f32 %v2072_v51, %v1946_v54  ;;  %v334_v0 = vadd.f32 %v2819_v24, %v333_v59  ;;  %v2882_v1 = vadd.f32 %v2819_v24, %v653_v61 }
 0x13c   :  { %917 = vst [vmem:[#allocation7 + $0x78] sm:$0xff] %v339_v58  ;;  %981 = vst [vmem:[#allocation7 + $0x278] sm:$0xff] %v2878_v60  ;;  %v1949_v9 = vmul.f32 %v339_v58, %v339_v58 }
 0x13d   :  { %v2074_v3 = vadd.f32 %v2073_v63, %v1947_v57  ;;  %916 = vst [vmem:[#allocation7 + $0x70] sm:$0xff] %v334_v0  ;;  %v1814_v4 = vadd.f32 %v1813_v62, %v334_v0  ;;  %v1948_v5 = vmul.f32 %v334_v0, %v334_v0  ;;  %v2433_v6 = vpop.f32.mrb[16].mxu0  ;;  %980 = vst [vmem:[#allocation7 + $0x270] sm:$0xff] %v2882_v1  ;;  %v2529_v8 = vpop.f32.mrb[16].mxu1 }
 0x13e   :  { %v349_v10 = vadd.f32 %v2433_v6, %v2819_v24  ;;  %v343_v11 = vpop.f32.mrb[17].mxu0  ;;  %v2888_v12 = vadd.f32 %v2529_v8, %v2819_v24  ;;  %v663_v13 = vpop.f32.mrb[17].mxu1 }
 0x13f   :  { %v1815_v14 = vadd.f32 %v1814_v4, %v339_v58  ;;  %v2075_v15 = vadd.f32 %v2074_v3, %v1948_v5  ;;  %v344_v17 = vadd.f32 %v2819_v24, %v343_v11  ;;  %v2892_v18 = vadd.f32 %v2819_v24, %v663_v13 }
 0x140   :  { %919 = vst [vmem:[#allocation7 + $0x88] sm:$0xff] %v349_v10  ;;  %983 = vst [vmem:[#allocation7 + $0x288] sm:$0xff] %v2888_v12  ;;  %v1951_v26 = vmul.f32 %v349_v10, %v349_v10 }
 0x141   :  { %v2076_v19 = vadd.f32 %v2075_v15, %v1949_v9  ;;  %918 = vst [vmem:[#allocation7 + $0x80] sm:$0xff] %v344_v17  ;;  %v1816_v20 = vadd.f32 %v1815_v14, %v344_v17  ;;  %v1950_v22 = vmul.f32 %v344_v17, %v344_v17  ;;  %v2436_v23 = vpop.f32.mrb[18].mxu0  ;;  %982 = vst [vmem:[#allocation7 + $0x280] sm:$0xff] %v2892_v18  ;;  %v2532_v25 = vpop.f32.mrb[18].mxu1 }
 0x142   :  { %v359_v27 = vadd.f32 %v2436_v23, %v2819_v24  ;;  %v353_v28 = vpop.f32.mrb[19].mxu0  ;;  %v2898_v29 = vadd.f32 %v2532_v25, %v2819_v24  ;;  %v673_v30 = vpop.f32.mrb[19].mxu1 }
 0x143   :  { %v1817_v32 = vadd.f32 %v1816_v20, %v349_v10  ;;  %v2077_v33 = vadd.f32 %v2076_v19, %v1950_v22  ;;  %v354_v34 = vadd.f32 %v2819_v24, %v353_v28  ;;  %v2902_v35 = vadd.f32 %v2819_v24, %v673_v30 }
 0x144   :  { %921 = vst [vmem:[#allocation7 + $0x98] sm:$0xff] %v359_v27  ;;  %985 = vst [vmem:[#allocation7 + $0x298] sm:$0xff] %v2898_v29  ;;  %v1953_v42 = vmul.f32 %v359_v27, %v359_v27 }
 0x145   :  { %v2078_v37 = vadd.f32 %v2077_v33, %v1951_v26  ;;  %920 = vst [vmem:[#allocation7 + $0x90] sm:$0xff] %v354_v34  ;;  %v1818_v38 = vadd.f32 %v1817_v32, %v354_v34  ;;  %v1952_v39 = vmul.f32 %v354_v34, %v354_v34  ;;  %v2439_v40 = vpop.f32.mrb[20].mxu0  ;;  %984 = vst [vmem:[#allocation7 + $0x290] sm:$0xff] %v2902_v35  ;;  %v2535_v41 = vpop.f32.mrb[20].mxu1 }
 0x146   :  { %v369_v43 = vadd.f32 %v2439_v40, %v2819_v24  ;;  %v363_v44 = vpop.f32.mrb[21].mxu0  ;;  %v2908_v46 = vadd.f32 %v2535_v41, %v2819_v24  ;;  %v683_v47 = vpop.f32.mrb[21].mxu1 }
 0x147   :  { %v1819_v48 = vadd.f32 %v1818_v38, %v359_v27  ;;  %v2079_v49 = vadd.f32 %v2078_v37, %v1952_v39  ;;  %v364_v51 = vadd.f32 %v2819_v24, %v363_v44  ;;  %v2912_v53 = vadd.f32 %v2819_v24, %v683_v47 }
 0x148   :  { %923 = vst [vmem:[#allocation7 + $0xa8] sm:$0xff] %v369_v43  ;;  %987 = vst [vmem:[#allocation7 + $0x2a8] sm:$0xff] %v2908_v46  ;;  %v1955_v59 = vmul.f32 %v369_v43, %v369_v43 }
 0x149   :  { %v2080_v54 = vadd.f32 %v2079_v49, %v1953_v42  ;;  %922 = vst [vmem:[#allocation7 + $0xa0] sm:$0xff] %v364_v51  ;;  %v1820_v55 = vadd.f32 %v1819_v48, %v364_v51  ;;  %v1954_v56 = vmul.f32 %v364_v51, %v364_v51  ;;  %v2442_v57 = vpop.f32.mrb[22].mxu0  ;;  %986 = vst [vmem:[#allocation7 + $0x2a0] sm:$0xff] %v2912_v53  ;;  %v2538_v58 = vpop.f32.mrb[22].mxu1 }
 0x14a   :  { %v379_v61 = vadd.f32 %v2442_v57, %v2819_v24  ;;  %v373_v62 = vpop.f32.mrb[23].mxu0  ;;  %v2918_v63 = vadd.f32 %v2538_v58, %v2819_v24  ;;  %v693_v0 = vpop.f32.mrb[23].mxu1 }
 0x14b   :  { %v1821_v3 = vadd.f32 %v1820_v55, %v369_v43  ;;  %v2081_v4 = vadd.f32 %v2080_v54, %v1954_v56  ;;  %v374_v5 = vadd.f32 %v2819_v24, %v373_v62  ;;  %v2922_v6 = vadd.f32 %v2819_v24, %v693_v0 }
 0x14c   :  { %925 = vst [vmem:[#allocation7 + $0xb8] sm:$0xff] %v379_v61  ;;  %989 = vst [vmem:[#allocation7 + $0x2b8] sm:$0xff] %v2918_v63  ;;  %v1957_v14 = vmul.f32 %v379_v61, %v379_v61 }
 0x14d   :  { %v2082_v8 = vadd.f32 %v2081_v4, %v1955_v59  ;;  %924 = vst [vmem:[#allocation7 + $0xb0] sm:$0xff] %v374_v5  ;;  %v1822_v9 = vadd.f32 %v1821_v3, %v374_v5  ;;  %v1956_v10 = vmul.f32 %v374_v5, %v374_v5  ;;  %v2445_v11 = vpop.f32.mrb[24].mxu0  ;;  %988 = vst [vmem:[#allocation7 + $0x2b0] sm:$0xff] %v2922_v6  ;;  %v2541_v13 = vpop.f32.mrb[24].mxu1 }
 0x14e   :  { %v389_v15 = vadd.f32 %v2445_v11, %v2819_v24  ;;  %v383_v17 = vpop.f32.mrb[25].mxu0  ;;  %v2928_v19 = vadd.f32 %v2541_v13, %v2819_v24  ;;  %v703_v20 = vpop.f32.mrb[25].mxu1 }
 0x14f   :  { %v1823_v22 = vadd.f32 %v1822_v9, %v379_v61  ;;  %v2083_v23 = vadd.f32 %v2082_v8, %v1956_v10  ;;  %v384_v25 = vadd.f32 %v2819_v24, %v383_v17  ;;  %v2932_v26 = vadd.f32 %v2819_v24, %v703_v20 }
 0x150   :  { %927 = vst [vmem:[#allocation7 + $0xc8] sm:$0xff] %v389_v15  ;;  %991 = vst [vmem:[#allocation7 + $0x2c8] sm:$0xff] %v2928_v19  ;;  %v1959_v34 = vmul.f32 %v389_v15, %v389_v15 }
 0x151   :  { %v2084_v27 = vadd.f32 %v2083_v23, %v1957_v14  ;;  %926 = vst [vmem:[#allocation7 + $0xc0] sm:$0xff] %v384_v25  ;;  %v1824_v28 = vadd.f32 %v1823_v22, %v384_v25  ;;  %v1958_v30 = vmul.f32 %v384_v25, %v384_v25  ;;  %v2448_v32 = vpop.f32.mrb[26].mxu0  ;;  %990 = vst [vmem:[#allocation7 + $0x2c0] sm:$0xff] %v2932_v26  ;;  %v2544_v33 = vpop.f32.mrb[26].mxu1 }
 0x152   :  { %v399_v37 = vadd.f32 %v2448_v32, %v2819_v24  ;;  %v393_v38 = vpop.f32.mrb[27].mxu0  ;;  %v2938_v39 = vadd.f32 %v2544_v33, %v2819_v24  ;;  %v713_v40 = vpop.f32.mrb[27].mxu1 }
 0x153   :  { %v1825_v41 = vadd.f32 %v1824_v28, %v389_v15  ;;  %v2085_v42 = vadd.f32 %v2084_v27, %v1958_v30  ;;  %v394_v43 = vadd.f32 %v2819_v24, %v393_v38  ;;  %v2942_v44 = vadd.f32 %v2819_v24, %v713_v40 }
 0x154   :  { %929 = vst [vmem:[#allocation7 + $0xd8] sm:$0xff] %v399_v37  ;;  %993 = vst [vmem:[#allocation7 + $0x2d8] sm:$0xff] %v2938_v39  ;;  %v1961_v55 = vmul.f32 %v399_v37, %v399_v37 }
 0x155   :  { %v2086_v47 = vadd.f32 %v2085_v42, %v1959_v34  ;;  %928 = vst [vmem:[#allocation7 + $0xd0] sm:$0xff] %v394_v43  ;;  %v1826_v48 = vadd.f32 %v1825_v41, %v394_v43  ;;  %v1960_v49 = vmul.f32 %v394_v43, %v394_v43  ;;  %v2451_v51 = vpop.f32.mrb[28].mxu0  ;;  %992 = vst [vmem:[#allocation7 + $0x2d0] sm:$0xff] %v2942_v44  ;;  %v2547_v54 = vpop.f32.mrb[28].mxu1 }
 0x156   :  { %v409_v56 = vadd.f32 %v2451_v51, %v2819_v24  ;;  %v403_v57 = vpop.f32.mrb[29].mxu0  ;;  %v2948_v58 = vadd.f32 %v2547_v54, %v2819_v24  ;;  %v723_v59 = vpop.f32.mrb[29].mxu1 }
 0x157   :  { %v1827_v61 = vadd.f32 %v1826_v48, %v399_v37  ;;  %v2087_v62 = vadd.f32 %v2086_v47, %v1960_v49  ;;  %v404_v0 = vadd.f32 %v2819_v24, %v403_v57  ;;  %v2952_v3 = vadd.f32 %v2819_v24, %v723_v59 }
 0x158   :  { %931 = vst [vmem:[#allocation7 + $0xe8] sm:$0xff] %v409_v56  ;;  %995 = vst [vmem:[#allocation7 + $0x2e8] sm:$0xff] %v2948_v58  ;;  %v1963_v11 = vmul.f32 %v409_v56, %v409_v56 }
 0x159   :  { %v2088_v4 = vadd.f32 %v2087_v62, %v1961_v55  ;;  %930 = vst [vmem:[#allocation7 + $0xe0] sm:$0xff] %v404_v0  ;;  %v1828_v5 = vadd.f32 %v1827_v61, %v404_v0  ;;  %v1962_v8 = vmul.f32 %v404_v0, %v404_v0  ;;  %v2454_v9 = vpop.f32.mrb[30].mxu0  ;;  %994 = vst [vmem:[#allocation7 + $0x2e0] sm:$0xff] %v2952_v3  ;;  %v2550_v10 = vpop.f32.mrb[30].mxu1 }
 0x15a   :  { %v419_v13 = vadd.f32 %v2454_v9, %v2819_v24  ;;  %v413_v14 = vpop.f32.mrb[31].mxu0  ;;  %v2958_v15 = vadd.f32 %v2550_v10, %v2819_v24  ;;  %v733_v17 = vpop.f32.mrb[31].mxu1 }
 0x15b   :  { %v1829_v20 = vadd.f32 %v1828_v5, %v409_v56  ;;  %v2089_v22 = vadd.f32 %v2088_v4, %v1962_v8  ;;  %v414_v23 = vadd.f32 %v2819_v24, %v413_v14  ;;  %v2962_v25 = vadd.f32 %v2819_v24, %v733_v17 }
 0x15c   :  { %933 = vst [vmem:[#allocation7 + $0xf8] sm:$0xff] %v419_v13  ;;  %997 = vst [vmem:[#allocation7 + $0x2f8] sm:$0xff] %v2958_v15  ;;  %v1965_v34 = vmul.f32 %v419_v13, %v419_v13 }
 0x15d   :  { %v2090_v27 = vadd.f32 %v2089_v22, %v1963_v11  ;;  %932 = vst [vmem:[#allocation7 + $0xf0] sm:$0xff] %v414_v23  ;;  %v1830_v28 = vadd.f32 %v1829_v20, %v414_v23  ;;  %v1964_v30 = vmul.f32 %v414_v23, %v414_v23  ;;  %v2457_v32 = vpop.f32.mrb[32].mxu0  ;;  %996 = vst [vmem:[#allocation7 + $0x2f0] sm:$0xff] %v2962_v25  ;;  %v2553_v33 = vpop.f32.mrb[32].mxu1 }
 0x15e   :  { %v429_v37 = vadd.f32 %v2457_v32, %v2819_v24  ;;  %v423_v38 = vpop.f32.mrb[33].mxu0  ;;  %v2968_v40 = vadd.f32 %v2553_v33, %v2819_v24  ;;  %v743_v41 = vpop.f32.mrb[33].mxu1 }
 0x15f   :  { %v1831_v42 = vadd.f32 %v1830_v28, %v419_v13  ;;  %v2091_v43 = vadd.f32 %v2090_v27, %v1964_v30  ;;  %v424_v47 = vadd.f32 %v2819_v24, %v423_v38  ;;  %v2972_v48 = vadd.f32 %v2819_v24, %v743_v41 }
 0x160   :  { %935 = vst [vmem:[#allocation7 + $0x108] sm:$0xff] %v429_v37  ;;  %999 = vst [vmem:[#allocation7 + $0x308] sm:$0xff] %v2968_v40  ;;  %v1967_v57 = vmul.f32 %v429_v37, %v429_v37 }
 0x161   :  { %v2092_v49 = vadd.f32 %v2091_v43, %v1965_v34  ;;  %934 = vst [vmem:[#allocation7 + $0x100] sm:$0xff] %v424_v47  ;;  %v1832_v51 = vadd.f32 %v1831_v42, %v424_v47  ;;  %v1966_v54 = vmul.f32 %v424_v47, %v424_v47  ;;  %v2460_v55 = vpop.f32.mrb[34].mxu0  ;;  %998 = vst [vmem:[#allocation7 + $0x300] sm:$0xff] %v2972_v48  ;;  %v2556_v56 = vpop.f32.mrb[34].mxu1 }
 0x162   :  { %v439_v59 = vadd.f32 %v2460_v55, %v2819_v24  ;;  %v433_v61 = vpop.f32.mrb[35].mxu0  ;;  %v2978_v62 = vadd.f32 %v2556_v56, %v2819_v24  ;;  %v753_v0 = vpop.f32.mrb[35].mxu1 }
 0x163   :  { %v1833_v4 = vadd.f32 %v1832_v51, %v429_v37  ;;  %v2093_v5 = vadd.f32 %v2092_v49, %v1966_v54  ;;  %v434_v8 = vadd.f32 %v2819_v24, %v433_v61  ;;  %v2982_v9 = vadd.f32 %v2819_v24, %v753_v0 }
 0x164   :  { %937 = vst [vmem:[#allocation7 + $0x118] sm:$0xff] %v439_v59  ;;  %1001 = vst [vmem:[#allocation7 + $0x318] sm:$0xff] %v2978_v62  ;;  %v1969_v20 = vmul.f32 %v439_v59, %v439_v59 }
 0x165   :  { %v2094_v10 = vadd.f32 %v2093_v5, %v1967_v57  ;;  %936 = vst [vmem:[#allocation7 + $0x110] sm:$0xff] %v434_v8  ;;  %v1834_v11 = vadd.f32 %v1833_v4, %v434_v8  ;;  %v1968_v13 = vmul.f32 %v434_v8, %v434_v8  ;;  %v2463_v14 = vpop.f32.mrb[36].mxu0  ;;  %1000 = vst [vmem:[#allocation7 + $0x310] sm:$0xff] %v2982_v9  ;;  %v2559_v17 = vpop.f32.mrb[36].mxu1 }
 0x166   :  { %v449_v22 = vadd.f32 %v2463_v14, %v2819_v24  ;;  %v443_v23 = vpop.f32.mrb[37].mxu0  ;;  %v2988_v27 = vadd.f32 %v2559_v17, %v2819_v24  ;;  %v763_v28 = vpop.f32.mrb[37].mxu1 }
 0x167   :  { %v1835_v30 = vadd.f32 %v1834_v11, %v439_v59  ;;  %v2095_v32 = vadd.f32 %v2094_v10, %v1968_v13  ;;  %v444_v33 = vadd.f32 %v2819_v24, %v443_v23  ;;  %v2992_v34 = vadd.f32 %v2819_v24, %v763_v28 }
 0x168   :  { %939 = vst [vmem:[#allocation7 + $0x128] sm:$0xff] %v449_v22  ;;  %1003 = vst [vmem:[#allocation7 + $0x328] sm:$0xff] %v2988_v27  ;;  %v1971_v47 = vmul.f32 %v449_v22, %v449_v22 }
 0x169   :  { %v2096_v37 = vadd.f32 %v2095_v32, %v1969_v20  ;;  %938 = vst [vmem:[#allocation7 + $0x120] sm:$0xff] %v444_v33  ;;  %v1836_v38 = vadd.f32 %v1835_v30, %v444_v33  ;;  %v1970_v41 = vmul.f32 %v444_v33, %v444_v33  ;;  %v2466_v42 = vpop.f32.mrb[38].mxu0  ;;  %1002 = vst [vmem:[#allocation7 + $0x320] sm:$0xff] %v2992_v34  ;;  %v2562_v43 = vpop.f32.mrb[38].mxu1 }
 0x16a   :  { %v459_v49 = vadd.f32 %v2466_v42, %v2819_v24  ;;  %v453_v51 = vpop.f32.mrb[39].mxu0  ;;  %v2998_v54 = vadd.f32 %v2562_v43, %v2819_v24  ;;  %v773_v55 = vpop.f32.mrb[39].mxu1 }
 0x16b   :  { %v1837_v56 = vadd.f32 %v1836_v38, %v449_v22  ;;  %v2097_v57 = vadd.f32 %v2096_v37, %v1970_v41  ;;  %v454_v59 = vadd.f32 %v2819_v24, %v453_v51  ;;  %v3002_v61 = vadd.f32 %v2819_v24, %v773_v55 }
 0x16c   :  { %941 = vst [vmem:[#allocation7 + $0x138] sm:$0xff] %v459_v49  ;;  %1005 = vst [vmem:[#allocation7 + $0x338] sm:$0xff] %v2998_v54  ;;  %v1973_v11 = vmul.f32 %v459_v49, %v459_v49 }
 0x16d   :  { %v2098_v0 = vadd.f32 %v2097_v57, %v1971_v47  ;;  %940 = vst [vmem:[#allocation7 + $0x130] sm:$0xff] %v454_v59  ;;  %v1838_v4 = vadd.f32 %v1837_v56, %v454_v59  ;;  %v1972_v5 = vmul.f32 %v454_v59, %v454_v59  ;;  %v2469_v8 = vpop.f32.mrb[40].mxu0  ;;  %1004 = vst [vmem:[#allocation7 + $0x330] sm:$0xff] %v3002_v61  ;;  %v2565_v10 = vpop.f32.mrb[40].mxu1 }
 0x16e   :  { %v469_v13 = vadd.f32 %v2469_v8, %v2819_v24  ;;  %v463_v14 = vpop.f32.mrb[41].mxu0  ;;  %v3008_v17 = vadd.f32 %v2565_v10, %v2819_v24  ;;  %v783_v20 = vpop.f32.mrb[41].mxu1 }
 0x16f   :  { %v1839_v22 = vadd.f32 %v1838_v4, %v459_v49  ;;  %v2099_v23 = vadd.f32 %v2098_v0, %v1972_v5  ;;  %v464_v28 = vadd.f32 %v2819_v24, %v463_v14  ;;  %v3012_v30 = vadd.f32 %v2819_v24, %v783_v20 }
 0x170   :  { %943 = vst [vmem:[#allocation7 + $0x148] sm:$0xff] %v469_v13  ;;  %1007 = vst [vmem:[#allocation7 + $0x348] sm:$0xff] %v3008_v17  ;;  %v1975_v42 = vmul.f32 %v469_v13, %v469_v13 }
 0x171   :  { %v2100_v32 = vadd.f32 %v2099_v23, %v1973_v11  ;;  %942 = vst [vmem:[#allocation7 + $0x140] sm:$0xff] %v464_v28  ;;  %v1840_v33 = vadd.f32 %v1839_v22, %v464_v28  ;;  %v1974_v37 = vmul.f32 %v464_v28, %v464_v28  ;;  %v2472_v38 = vpop.f32.mrb[42].mxu0  ;;  %1006 = vst [vmem:[#allocation7 + $0x340] sm:$0xff] %v3012_v30  ;;  %v2568_v41 = vpop.f32.mrb[42].mxu1 }
 0x172   :  { %v479_v43 = vadd.f32 %v2472_v38, %v2819_v24  ;;  %v473_v47 = vpop.f32.mrb[43].mxu0  ;;  %v3018_v49 = vadd.f32 %v2568_v41, %v2819_v24  ;;  %v793_v51 = vpop.f32.mrb[43].mxu1 }
 0x173   :  { %v1841_v55 = vadd.f32 %v1840_v33, %v469_v13  ;;  %v2101_v56 = vadd.f32 %v2100_v32, %v1974_v37  ;;  %v474_v57 = vadd.f32 %v2819_v24, %v473_v47  ;;  %v3022_v59 = vadd.f32 %v2819_v24, %v793_v51 }
 0x174   :  { %945 = vst [vmem:[#allocation7 + $0x158] sm:$0xff] %v479_v43  ;;  %1009 = vst [vmem:[#allocation7 + $0x358] sm:$0xff] %v3018_v49  ;;  %v1977_v11 = vmul.f32 %v479_v43, %v479_v43 }
 0x175   :  { %v2102_v0 = vadd.f32 %v2101_v56, %v1975_v42  ;;  %944 = vst [vmem:[#allocation7 + $0x150] sm:$0xff] %v474_v57  ;;  %v1842_v4 = vadd.f32 %v1841_v55, %v474_v57  ;;  %v1976_v5 = vmul.f32 %v474_v57, %v474_v57  ;;  %v2475_v8 = vpop.f32.mrb[44].mxu0  ;;  %1008 = vst [vmem:[#allocation7 + $0x350] sm:$0xff] %v3022_v59  ;;  %v2571_v10 = vpop.f32.mrb[44].mxu1 }
 0x176   :  { %v489_v13 = vadd.f32 %v2475_v8, %v2819_v24  ;;  %v483_v14 = vpop.f32.mrb[45].mxu0  ;;  %v3028_v20 = vadd.f32 %v2571_v10, %v2819_v24  ;;  %v803_v22 = vpop.f32.mrb[45].mxu1 }
 0x177   :  { %v1843_v23 = vadd.f32 %v1842_v4, %v479_v43  ;;  %v2103_v28 = vadd.f32 %v2102_v0, %v1976_v5  ;;  %v484_v32 = vadd.f32 %v2819_v24, %v483_v14  ;;  %v3032_v33 = vadd.f32 %v2819_v24, %v803_v22 }
 0x178   :  { %947 = vst [vmem:[#allocation7 + $0x168] sm:$0xff] %v489_v13  ;;  %1011 = vst [vmem:[#allocation7 + $0x368] sm:$0xff] %v3028_v20  ;;  %v1979_v51 = vmul.f32 %v489_v13, %v489_v13 }
 0x179   :  { %v2104_v37 = vadd.f32 %v2103_v28, %v1977_v11  ;;  %946 = vst [vmem:[#allocation7 + $0x160] sm:$0xff] %v484_v32  ;;  %v1844_v38 = vadd.f32 %v1843_v23, %v484_v32  ;;  %v1978_v41 = vmul.f32 %v484_v32, %v484_v32  ;;  %v2478_v42 = vpop.f32.mrb[46].mxu0  ;;  %1010 = vst [vmem:[#allocation7 + $0x360] sm:$0xff] %v3032_v33  ;;  %v2574_v47 = vpop.f32.mrb[46].mxu1 }
 0x17a   :  { %v499_v43 = vadd.f32 %v2478_v42, %v2819_v24  ;;  %v493_v55 = vpop.f32.mrb[47].mxu0  ;;  %v3038_v56 = vadd.f32 %v2574_v47, %v2819_v24  ;;  %v813_v57 = vpop.f32.mrb[47].mxu1 }
 0x17b   :  { %v1845_v0 = vadd.f32 %v1844_v38, %v489_v13  ;;  %v2105_v4 = vadd.f32 %v2104_v37, %v1978_v41  ;;  %v494_v5 = vadd.f32 %v2819_v24, %v493_v55  ;;  %v3042_v8 = vadd.f32 %v2819_v24, %v813_v57 }
 0x17c   :  { %3362 = vst [vmem:[#allocation14_spill] sm:$0xff] %v3038_v56  ;;  %949 = vst [vmem:[#allocation7 + $0x178] sm:$0xff] %v499_v43  ;;  %v1981_v28 = vmul.f32 %v499_v43, %v499_v43 }
 0x17d   :  { %3363 = vst [vmem:[#allocation15_spill] sm:$0xff] %v3042_v8  ;;  %1013 = vst [vmem:[#allocation7 + $0x378] sm:$0xff] %v3038_v56  ;;  %v2106_v10 = vadd.f32 %v2105_v4, %v1979_v51  ;;  %v1846_v11 = vadd.f32 %v1845_v0, %v494_v5  ;;  %v1980_v14 = vmul.f32 %v494_v5, %v494_v5  ;;  %v2481_v22 = vpop.f32.mrb[48].mxu0  ;;  %v2577_v23 = vpop.f32.mrb[48].mxu1 }
 0x17e   :  { %948 = vst [vmem:[#allocation7 + $0x170] sm:$0xff] %v494_v5  ;;  %1012 = vst [vmem:[#allocation7 + $0x370] sm:$0xff] %v3042_v8  ;;  %v509_v13 = vadd.f32 %v2481_v22, %v2819_v24  ;;  %v503_v32 = vpop.f32.mrb[49].mxu0  ;;  %v3048_v37 = vadd.f32 %v2577_v23, %v2819_v24  ;;  %v823_v38 = vpop.f32.mrb[49].mxu1 }
 0x17f   :  { %v1847_v41 = vadd.f32 %v1846_v11, %v499_v43  ;;  %v2107_v42 = vadd.f32 %v2106_v10, %v1980_v14  ;;  %v504_v47 = vadd.f32 %v2819_v24, %v503_v32  ;;  %v3052_v51 = vadd.f32 %v2819_v24, %v823_v38 }
 0x180   :  { %3364 = vst [vmem:[#allocation16_spill] sm:$0xff] %v3048_v37  ;;  %951 = vst [vmem:[#allocation7 + $0x188] sm:$0xff] %v509_v13  ;;  %v1983_v22 = vmul.f32 %v509_v13, %v509_v13 }
 0x181   :  { %3365 = vst [vmem:[#allocation17_spill] sm:$0xff] %v3052_v51  ;;  %1015 = vst [vmem:[#allocation7 + $0x388] sm:$0xff] %v3048_v37  ;;  %v2108_v55 = vadd.f32 %v2107_v42, %v1981_v28  ;;  %v1848_v57 = vadd.f32 %v1847_v41, %v504_v47  ;;  %v1982_v0 = vmul.f32 %v504_v47, %v504_v47  ;;  %v2484_v4 = vpop.f32.mrb[50].mxu0  ;;  %v2580_v5 = vpop.f32.mrb[50].mxu1 }
 0x182   :  { %950 = vst [vmem:[#allocation7 + $0x180] sm:$0xff] %v504_v47  ;;  %1014 = vst [vmem:[#allocation7 + $0x380] sm:$0xff] %v3052_v51  ;;  %v519_v43 = vadd.f32 %v2484_v4, %v2819_v24  ;;  %v513_v10 = vpop.f32.mrb[51].mxu0  ;;  %v3058_v11 = vadd.f32 %v2580_v5, %v2819_v24  ;;  %v833_v14 = vpop.f32.mrb[51].mxu1 }
 0x183   :  { %v1849_v23 = vadd.f32 %v1848_v57, %v509_v13  ;;  %v2109_v32 = vadd.f32 %v2108_v55, %v1982_v0  ;;  %v514_v38 = vadd.f32 %v2819_v24, %v513_v10  ;;  %v3062_v28 = vadd.f32 %v2819_v24, %v833_v14 }
 0x184   :  { %3366 = vst [vmem:[#allocation18_spill] sm:$0xff] %v3058_v11  ;;  %953 = vst [vmem:[#allocation7 + $0x198] sm:$0xff] %v519_v43  ;;  %v1985_v37 = vmul.f32 %v519_v43, %v519_v43 }
 0x185   :  { %3367 = vst [vmem:[#allocation19_spill] sm:$0xff] %v3062_v28  ;;  %1017 = vst [vmem:[#allocation7 + $0x398] sm:$0xff] %v3058_v11  ;;  %v2110_v41 = vadd.f32 %v2109_v32, %v1983_v22  ;;  %v1850_v42 = vadd.f32 %v1849_v23, %v514_v38  ;;  %v1984_v47 = vmul.f32 %v514_v38, %v514_v38  ;;  %v2487_v4 = vpop.f32.mrb[52].mxu0  ;;  %v2583_v5 = vpop.f32.mrb[52].mxu1 }
 0x186   :  { %952 = vst [vmem:[#allocation7 + $0x190] sm:$0xff] %v514_v38  ;;  %1016 = vst [vmem:[#allocation7 + $0x390] sm:$0xff] %v3062_v28  ;;  %v529_v13 = vadd.f32 %v2487_v4, %v2819_v24  ;;  %v523_v55 = vpop.f32.mrb[53].mxu0  ;;  %v3068_v57 = vadd.f32 %v2583_v5, %v2819_v24  ;;  %v843_v0 = vpop.f32.mrb[53].mxu1 }
 0x187   :  { %v1851_v10 = vadd.f32 %v1850_v42, %v519_v43  ;;  %v2111_v14 = vadd.f32 %v2110_v41, %v1984_v47  ;;  %v524_v11 = vadd.f32 %v2819_v24, %v523_v55  ;;  %v3072_v22 = vadd.f32 %v2819_v24, %v843_v0 }
 0x188   :  { %3368 = vst [vmem:[#allocation20_spill] sm:$0xff] %v3068_v57  ;;  %955 = vst [vmem:[#allocation7 + $0x1a8] sm:$0xff] %v529_v13  ;;  %v1987_v28 = vmul.f32 %v529_v13, %v529_v13 }
 0x189   :  { %3369 = vst [vmem:[#allocation21_spill] sm:$0xff] %v3072_v22  ;;  %1019 = vst [vmem:[#allocation7 + $0x3a8] sm:$0xff] %v3068_v57  ;;  %v2112_v23 = vadd.f32 %v2111_v14, %v1985_v37  ;;  %v1852_v32 = vadd.f32 %v1851_v10, %v524_v11  ;;  %v1986_v38 = vmul.f32 %v524_v11, %v524_v11  ;;  %v2490_v4 = vpop.f32.mrb[54].mxu0  ;;  %v2586_v5 = vpop.f32.mrb[54].mxu1 }
 0x18a   :  { %954 = vst [vmem:[#allocation7 + $0x1a0] sm:$0xff] %v524_v11  ;;  %1018 = vst [vmem:[#allocation7 + $0x3a0] sm:$0xff] %v3072_v22  ;;  %v539_v43 = vadd.f32 %v2490_v4, %v2819_v24  ;;  %v533_v41 = vpop.f32.mrb[55].mxu0  ;;  %v3078_v42 = vadd.f32 %v2586_v5, %v2819_v24  ;;  %v853_v47 = vpop.f32.mrb[55].mxu1 }
 0x18b   :  { %v1853_v55 = vadd.f32 %v1852_v32, %v529_v13  ;;  %v2113_v0 = vadd.f32 %v2112_v23, %v1986_v38  ;;  %v534_v57 = vadd.f32 %v2819_v24, %v533_v41  ;;  %v3082_v37 = vadd.f32 %v2819_v24, %v853_v47 }
 0x18c   :  { %3370 = vst [vmem:[#allocation22_spill] sm:$0xff] %v3078_v42  ;;  %957 = vst [vmem:[#allocation7 + $0x1b8] sm:$0xff] %v539_v43  ;;  %v1989_v22 = vmul.f32 %v539_v43, %v539_v43 }
 0x18d   :  { %3371 = vst [vmem:[#allocation23_spill] sm:$0xff] %v3082_v37  ;;  %1021 = vst [vmem:[#allocation7 + $0x3b8] sm:$0xff] %v3078_v42  ;;  %v2114_v11 = vadd.f32 %v2113_v0, %v1987_v28  ;;  %v1854_v10 = vadd.f32 %v1853_v55, %v534_v57  ;;  %v1988_v14 = vmul.f32 %v534_v57, %v534_v57  ;;  %v2493_v4 = vpop.f32.mrb[56].mxu0  ;;  %v2589_v5 = vpop.f32.mrb[56].mxu1 }
 0x18e   :  { %956 = vst [vmem:[#allocation7 + $0x1b0] sm:$0xff] %v534_v57  ;;  %1020 = vst [vmem:[#allocation7 + $0x3b0] sm:$0xff] %v3082_v37  ;;  %v549_v13 = vadd.f32 %v2493_v4, %v2819_v24  ;;  %v543_v23 = vpop.f32.mrb[57].mxu0  ;;  %v3088_v32 = vadd.f32 %v2589_v5, %v2819_v24  ;;  %v863_v38 = vpop.f32.mrb[57].mxu1 }
 0x18f   :  { %v1855_v41 = vadd.f32 %v1854_v10, %v539_v43  ;;  %v2115_v47 = vadd.f32 %v2114_v11, %v1988_v14  ;;  %v544_v42 = vadd.f32 %v2819_v24, %v543_v23  ;;  %v3092_v28 = vadd.f32 %v2819_v24, %v863_v38  ;;  %v2653_v43 = vld [vmem:[%s3323_s2] ss:$0 sm:$0xff]  ;;  %s2759_s2 = smov [#allocation7]  }
 0x190   :  { %3372 = vst [vmem:[#allocation24_spill] sm:$0xff] %v3088_v32  ;;  %959 = vst [vmem:[#allocation7 + $0x1c8] sm:$0xff] %v549_v13  ;;  %v1991_v37 = vmul.f32 %v549_v13, %v549_v13  ;;  %s2203_s17 = sshll.u32 %s2759_s2, 4  ;;  %s2204_s17 = int_to_ptr.vmem [resolvable:$true] %s2203_s17 }
 0x191   :  { %3373 = vst [vmem:[#allocation25_spill] sm:$0xff] %v3092_v28  ;;  %1023 = vst [vmem:[#allocation7 + $0x3c8] sm:$0xff] %v3088_v32  ;;  %v2116_v57 = vadd.f32 %v2115_v47, %v1989_v22  ;;  %v1856_v55 = vadd.f32 %v1855_v41, %v544_v42  ;;  %v1990_v0 = vmul.f32 %v544_v42, %v544_v42  ;;  %v2496_v4 = vpop.f32.mrb[58].mxu0  ;;  %v2592_v5 = vpop.f32.mrb[58].mxu1  ;;  %s2703_s18 = scalar_lea.vmem %s2204_s17, 16384  ;;  %p2708_p3 = scmp.lt.s32.totalorder %s2204_s17, %s2204_s17 }
 0x192   :  { %958 = vst [vmem:[#allocation7 + $0x1c0] sm:$0xff] %v544_v42  ;;  %1022 = vst [vmem:[#allocation7 + $0x3c0] sm:$0xff] %v3092_v28  ;;  %v559_v11 = vadd.f32 %v2653_v43, %v2496_v4  ;;  %v553_v10 = vpop.f32.mrb[59].mxu0  ;;  %v3099_v24 = vadd.f32 %v2653_v43, %v2592_v5  ;;  %v873_v14 = vpop.f32.mrb[59].mxu1  ;;  %p2704_p2 = scmp.ne.s32.totalorder %s2204_s17, %s2703_s18  ;;  %p2709_p4 = scmp.lt.s32.totalorder %s2703_s18, %s2703_s18 }
 0x193   :  { %v1857_v23 = vadd.f32 %v1856_v55, %v549_v13  ;;  %v2117_v38 = vadd.f32 %v2116_v57, %v1990_v0  ;;  %v554_v22 = vadd.f32 %v2653_v43, %v553_v10  ;;  %v3101_v47 = vadd.f32 %v2653_v43, %v873_v14 }
 0x194   :  { %3374 = vst [vmem:[#allocation26_spill] sm:$0xff] %v3099_v24  ;;  %961 = vst [vmem:[#allocation7 + $0x1d8] sm:$0xff] %v559_v11  ;;  %v1993_v51 = vmul.f32 %v559_v11, %v559_v11  ;;  %p2710_p5 = por %p2709_p4, %p2708_p3 }
 0x195   :  { %3375 = vst [vmem:[#allocation27_spill] sm:$0xff] %v3101_v47  ;;  %1025 = vst [vmem:[#allocation7 + $0x3d8] sm:$0xff] %v3099_v24  ;;  %v2118_v42 = vadd.f32 %v2117_v38, %v1991_v37  ;;  %v1858_v41 = vadd.f32 %v1857_v23, %v554_v22  ;;  %v1992_v32 = vmul.f32 %v554_v22, %v554_v22  ;;  %v2499_v28 = vpop.f32.mrb[60].mxu0  ;;  %v2595_v4 = vpop.f32.mrb[60].mxu1 }
 0x196   :  { %960 = vst [vmem:[#allocation7 + $0x1d0] sm:$0xff] %v554_v22  ;;  %1024 = vst [vmem:[#allocation7 + $0x3d0] sm:$0xff] %v3101_v47  ;;  %v569_v5 = vadd.f32 %v2653_v43, %v2499_v28  ;;  %v563_v56 = vpop.f32.mrb[61].mxu0  ;;  %v3105_v8 = vadd.f32 %v2653_v43, %v2595_v4  ;;  %v883_v13 = vpop.f32.mrb[61].mxu1  ;;  %p2711_p6 = pnand %p2710_p5, %p2704_p2 }
 0x197   :  { %v1859_v57 = vadd.f32 %v1858_v41, %v559_v11  ;;  %v2119_v55 = vadd.f32 %v2118_v42, %v1992_v32  ;;  %v564_v0 = vadd.f32 %v2653_v43, %v563_v56  ;;  %v3107_v10 = vadd.f32 %v2653_v43, %v883_v13 }
 0x198   :  { %3376 = vst [vmem:[#allocation28_spill] sm:$0xff] %v3105_v8  ;;  %963 = vst [vmem:[#allocation7 + $0x1e8] sm:$0xff] %v569_v5  ;;  %v1995_v22 = vmul.f32 %v569_v5, %v569_v5 }
 0x199   :  { %3377 = vst [vmem:[#allocation29_spill] sm:$0xff] %v3107_v10  ;;  %1027 = vst [vmem:[#allocation7 + $0x3e8] sm:$0xff] %v3105_v8  ;;  %v2120_v37 = vadd.f32 %v2119_v55, %v1993_v51  ;;  %v1860_v14 = vadd.f32 %v1859_v57, %v564_v0  ;;  %v1994_v23 = vmul.f32 %v564_v0, %v564_v0  ;;  %v2502_v38 = vpop.f32.mrb[62].mxu0  ;;  %v2598_v28 = vpop.f32.mrb[62].mxu1 }
 0x19a   :  { %962 = vst [vmem:[#allocation7 + $0x1e0] sm:$0xff] %v564_v0  ;;  %1026 = vst [vmem:[#allocation7 + $0x3e0] sm:$0xff] %v3107_v10  ;;  %v579_v4 = vadd.f32 %v2653_v43, %v2502_v38  ;;  %v573_v24 = vpop.f32.mrb[63].mxu0  ;;  %v3111_v47 = vadd.f32 %v2653_v43, %v2598_v28  ;;  %v893_v32 = vpop.f32.mrb[63].mxu1  ;;  %v2654_v28 = vld [vmem:[#allocation7 + $0x200] sm:$0xff] }
 0x19b   :  { %v1861_v56 = vadd.f32 %v1860_v14, %v569_v5  ;;  %v2121_v11 = vadd.f32 %v2120_v37, %v1994_v23  ;;  %v574_v42 = vadd.f32 %v2653_v43, %v573_v24  ;;  %v3113_v41 = vadd.f32 %v2653_v43, %v893_v32  ;;  %v2655_v37 = vld [vmem:[#allocation7 + $0x208] sm:$0xff]  ;;  %v2656_v23 = vld [vmem:[#allocation7 + $0x210] sm:$0xff] }
 0x19c   :  { %3378 = vst [vmem:[#allocation30_spill] sm:$0xff] %v3111_v47  ;;  %965 = vst [vmem:[#allocation7 + $0x1f8] sm:$0xff] %v579_v4  ;;  %v1997_v55 = vmul.f32 %v579_v4, %v579_v4  ;;  %v1998_v8 = vmul.f32 %v2654_v28, %v2654_v28  ;;  %v1999_v24 = vmul.f32 %v2655_v37, %v2655_v37 }
 0x19d   :  { %3379 = vst [vmem:[#allocation31_spill] sm:$0xff] %v3113_v41  ;;  %1029 = vst [vmem:[#allocation7 + $0x3f8] sm:$0xff] %v3111_v47  ;;  %v2122_v51 = vadd.f32 %v2121_v11, %v1995_v22  ;;  %v1862_v13 = vadd.f32 %v1861_v56, %v574_v42  ;;  %v1996_v57 = vmul.f32 %v574_v42, %v574_v42  ;;  %v2657_v56 = vld [vmem:[#allocation7 + $0x218] sm:$0xff] }
 0x19e   :  { %964 = vst [vmem:[#allocation7 + $0x1f0] sm:$0xff] %v574_v42  ;;  %1028 = vst [vmem:[#allocation7 + $0x3f0] sm:$0xff] %v3113_v41  ;;  %v2000_v32 = vmul.f32 %v2656_v23, %v2656_v23  ;;  %v2001_v11 = vmul.f32 %v2657_v56, %v2657_v56 }
 0x19f   :  { %v1863_v0 = vadd.f32 %v1862_v13, %v579_v4  ;;  %v2123_v38 = vadd.f32 %v2122_v51, %v1996_v57  ;;  %v2658_v4 = vld [vmem:[#allocation7 + $0x220] sm:$0xff] }
 0x1a0   :  { %v2002_v51 = vmul.f32 %v2658_v4, %v2658_v4 }
 0x1a1   :  { %v2124_v10 = vadd.f32 %v2123_v38, %v1997_v55  ;;  %v1864_v5 = vadd.f32 %v2654_v28, %v1863_v0 }
 0x1a3   :  { %v1865_v43 = vadd.f32 %v2655_v37, %v1864_v5  ;;  %v2125_v14 = vadd.f32 %v2124_v10, %v1998_v8 }
 0x1a5   :  { %v2126_v47 = vadd.f32 %v2125_v14, %v1999_v24  ;;  %v1866_v22 = vadd.f32 %v2656_v23, %v1865_v43 }
 0x1a7   :  { %v1867_v42 = vadd.f32 %v2657_v56, %v1866_v22  ;;  %v2127_v41 = vadd.f32 %v2126_v47, %v2000_v32 }
 0x1a8   :  { %2714 = shalt.err (!%p2711_p6)
}
 0x1a9   :  { %s2715_s21 = scalar_lea.hbm %s3324_s3, 16384 }
 0x1aa   :  { %p2716_p7 = scmp.ne.s32.totalorder %s3324_s3, %s2715_s21  ;;  %p2719_p8 = scmp.lt.u32.totalorder %s2715_s21, %s3324_s3 }
 0x1ac   :  { %p2721_p9 = pnand %p2719_p8, %p2716_p7 }
 0x1ae   :  { %2724 = shalt.err (!%p2721_p9)
}
 0x1af   :  { %2209 = dma.vmem_to_hbm [thread:$0]  %s2204_s17, 16384, %s3324_s3, [#allocation4], %s2756_s25, %s2756_s25, %s2757_s26   ;;  %v2128_v8 = vadd.f32 %v2127_v41, %v2001_v11  ;;  %v1868_v47 = vadd.f32 %v2658_v4, %v1867_v42  ;;  %v2003_v10 = vmul.f32 %v2831_v52, %v2831_v52  ;;  %v2004_v55 = vmul.f32 %v2842_v7, %v2842_v7 }
 0x1b0   :  { %v2005_v28 = vmul.f32 %v2838_v2, %v2838_v2  ;;  %v2006_v41 = vmul.f32 %v2852_v21, %v2852_v21  ;;  %s2760_s3 = smov [#allocation8]   ;;  %vm2195_vm0 = vcmask 1040384  }
 0x1b1   :  { %v2129_v13 = vadd.f32 %v2128_v8, %v2002_v51  ;;  %v1869_v57 = vadd.f32 %v1868_v47, %v2831_v52  ;;  %v2007_v52 = vmul.f32 %v2848_v16, %v2848_v16  ;;  %s2216_s25 = sshll.u32 %s2760_s3, 4  ;;  %s2217_s25 = int_to_ptr.vmem [resolvable:$true] %s2216_s25 }
 0x1b2   :  { %s2725_s26 = scalar_lea.vmem %s2217_s25, 32  ;;  %p2730_p11 = scmp.lt.s32.totalorder %s2217_s25, %s2217_s25 }
 0x1b3   :  { %v1870_v0 = vadd.f32 %v1869_v57, %v2842_v7  ;;  %v2130_v38 = vadd.f32 %v2129_v13, %v2003_v10  ;;  %v2008_v7 = vmul.f32 %v2862_v36, %v2862_v36  ;;  %p2726_p10 = scmp.ne.s32.totalorder %s2217_s25, %s2725_s26  ;;  %p2731_p12 = scmp.lt.s32.totalorder %s2725_s26, %s2725_s26 }
 0x1b5   :  { %v2131_v5 = vadd.f32 %v2130_v38, %v2004_v55  ;;  %v1871_v37 = vadd.f32 %v1870_v0, %v2838_v2  ;;  %v2009_v2 = vmul.f32 %v2858_v31, %v2858_v31  ;;  %p2732_p13 = por %p2731_p12, %p2730_p11 }
 0x1b7   :  { %v1872_v24 = vadd.f32 %v1871_v37, %v2852_v21  ;;  %v2132_v43 = vadd.f32 %v2131_v5, %v2005_v28  ;;  %v2010_v21 = vmul.f32 %v2872_v50, %v2872_v50  ;;  %p2733_p0 = pnand %p2732_p13, %p2726_p10 }
 0x1b9   :  { %v2133_v14 = vadd.f32 %v2132_v43, %v2006_v41  ;;  %v1873_v23 = vadd.f32 %v1872_v24, %v2848_v16  ;;  %v2011_v16 = vmul.f32 %v2868_v45, %v2868_v45 }
 0x1bb   :  { %v1874_v32 = vadd.f32 %v1873_v23, %v2862_v36  ;;  %v2134_v22 = vadd.f32 %v2133_v14, %v2007_v52  ;;  %v2012_v36 = vmul.f32 %v2882_v1, %v2882_v1 }
 0x1bd   :  { %v2135_v56 = vadd.f32 %v2134_v22, %v2008_v7  ;;  %v1875_v11 = vadd.f32 %v1874_v32, %v2858_v31  ;;  %v2013_v31 = vmul.f32 %v2878_v60, %v2878_v60 }
 0x1bf   :  { %v1876_v42 = vadd.f32 %v1875_v11, %v2872_v50  ;;  %v2136_v4 = vadd.f32 %v2135_v56, %v2009_v2  ;;  %v2014_v50 = vmul.f32 %v2892_v18, %v2892_v18 }
 0x1c1   :  { %v2137_v51 = vadd.f32 %v2136_v4, %v2010_v21  ;;  %v1877_v8 = vadd.f32 %v1876_v42, %v2868_v45  ;;  %v2015_v45 = vmul.f32 %v2888_v12, %v2888_v12 }
 0x1c3   :  { %v1878_v47 = vadd.f32 %v1877_v8, %v2882_v1  ;;  %v2138_v10 = vadd.f32 %v2137_v51, %v2011_v16  ;;  %v2016_v1 = vmul.f32 %v2902_v35, %v2902_v35 }
 0x1c5   :  { %v2139_v13 = vadd.f32 %v2138_v10, %v2012_v36  ;;  %v1879_v57 = vadd.f32 %v1878_v47, %v2878_v60  ;;  %v2017_v60 = vmul.f32 %v2898_v29, %v2898_v29 }
 0x1c7   :  { %v1880_v55 = vadd.f32 %v1879_v57, %v2892_v18  ;;  %v2140_v0 = vadd.f32 %v2139_v13, %v2013_v31  ;;  %v2018_v18 = vmul.f32 %v2912_v53, %v2912_v53 }
 0x1c9   :  { %v2141_v38 = vadd.f32 %v2140_v0, %v2014_v50  ;;  %v1881_v28 = vadd.f32 %v1880_v55, %v2888_v12  ;;  %v2019_v12 = vmul.f32 %v2908_v46, %v2908_v46 }
 0x1cb   :  { %v1882_v5 = vadd.f32 %v1881_v28, %v2902_v35  ;;  %v2142_v37 = vadd.f32 %v2141_v38, %v2015_v45  ;;  %v2020_v35 = vmul.f32 %v2922_v6, %v2922_v6 }
 0x1cd   :  { %v2143_v41 = vadd.f32 %v2142_v37, %v2016_v1  ;;  %v1883_v24 = vadd.f32 %v1882_v5, %v2898_v29  ;;  %v2021_v29 = vmul.f32 %v2918_v63, %v2918_v63 }
 0x1cf   :  { %v1884_v43 = vadd.f32 %v1883_v24, %v2912_v53  ;;  %v2144_v52 = vadd.f32 %v2143_v41, %v2017_v60  ;;  %v2022_v53 = vmul.f32 %v2932_v26, %v2932_v26 }
 0x1d1   :  { %v2145_v14 = vadd.f32 %v2144_v52, %v2018_v18  ;;  %v1885_v23 = vadd.f32 %v1884_v43, %v2908_v46  ;;  %v2023_v46 = vmul.f32 %v2928_v19, %v2928_v19 }
 0x1d3   :  { %v1886_v7 = vadd.f32 %v1885_v23, %v2922_v6  ;;  %v2146_v32 = vadd.f32 %v2145_v14, %v2019_v12  ;;  %v2024_v6 = vmul.f32 %v2942_v44, %v2942_v44 }
 0x1d5   :  { %v2147_v22 = vadd.f32 %v2146_v32, %v2020_v35  ;;  %v1887_v2 = vadd.f32 %v1886_v7, %v2918_v63  ;;  %v2025_v63 = vmul.f32 %v2938_v39, %v2938_v39 }
 0x1d7   :  { %v1888_v56 = vadd.f32 %v1887_v2, %v2932_v26  ;;  %v2148_v11 = vadd.f32 %v2147_v22, %v2021_v29  ;;  %v2026_v26 = vmul.f32 %v2952_v3, %v2952_v3 }
 0x1d9   :  { %v2149_v21 = vadd.f32 %v2148_v11, %v2022_v53  ;;  %v1889_v42 = vadd.f32 %v1888_v56, %v2928_v19  ;;  %v2027_v19 = vmul.f32 %v2948_v58, %v2948_v58 }
 0x1db   :  { %v1890_v4 = vadd.f32 %v1889_v42, %v2942_v44  ;;  %v2150_v16 = vadd.f32 %v2149_v21, %v2023_v46  ;;  %v2028_v44 = vmul.f32 %v2962_v25, %v2962_v25 }
 0x1dd   :  { %v2151_v51 = vadd.f32 %v2150_v16, %v2024_v6  ;;  %v1891_v8 = vadd.f32 %v1890_v4, %v2938_v39  ;;  %v2029_v39 = vmul.f32 %v2958_v15, %v2958_v15 }
 0x1df   :  { %v1892_v36 = vadd.f32 %v1891_v8, %v2952_v3  ;;  %v2152_v47 = vadd.f32 %v2151_v51, %v2025_v63  ;;  %v2030_v3 = vmul.f32 %v2972_v48, %v2972_v48  ;;  %v3381_v63 = vld [vmem:[#allocation14_spill] sm:$0xff] }
 0x1e1   :  { %v2153_v10 = vadd.f32 %v2152_v47, %v2026_v26  ;;  %v1893_v31 = vadd.f32 %v1892_v36, %v2948_v58  ;;  %v2031_v58 = vmul.f32 %v2968_v40, %v2968_v40 }
 0x1e3   :  { %v1894_v13 = vadd.f32 %v1893_v31, %v2962_v25  ;;  %v2154_v57 = vadd.f32 %v2153_v10, %v2027_v19  ;;  %v2032_v25 = vmul.f32 %v2982_v9, %v2982_v9  ;;  %v3383_v19 = vld [vmem:[#allocation16_spill] sm:$0xff] }
 0x1e5   :  { %v2155_v50 = vadd.f32 %v2154_v57, %v2028_v44  ;;  %v1895_v55 = vadd.f32 %v1894_v13, %v2958_v15  ;;  %v2033_v15 = vmul.f32 %v2978_v62, %v2978_v62  ;;  %v3384_v44 = vld [vmem:[#allocation19_spill] sm:$0xff] }
 0x1e6   :  { %v2048_v13 = vmul.f32 %v3384_v44, %v3384_v44 }
 0x1e7   :  { %v1896_v0 = vadd.f32 %v1895_v55, %v2972_v48  ;;  %v2156_v45 = vadd.f32 %v2155_v50, %v2029_v39  ;;  %v2034_v48 = vmul.f32 %v2992_v34, %v2992_v34  ;;  %v3385_v50 = vld [vmem:[#allocation18_spill] sm:$0xff] }
 0x1e8   :  { %v2049_v55 = vmul.f32 %v3385_v50, %v3385_v50 }
 0x1e9   :  { %v2157_v38 = vadd.f32 %v2156_v45, %v2030_v3  ;;  %v1897_v28 = vadd.f32 %v1896_v0, %v2968_v40  ;;  %v2035_v40 = vmul.f32 %v2988_v27, %v2988_v27  ;;  %v3386_v45 = vld [vmem:[#allocation21_spill] sm:$0xff] }
 0x1eb   :  { %v1898_v1 = vadd.f32 %v1897_v28, %v2982_v9  ;;  %v2158_v5 = vadd.f32 %v2157_v38, %v2031_v58  ;;  %v2036_v9 = vmul.f32 %v3002_v61, %v3002_v61  ;;  %v2050_v58 = vmul.f32 %v3386_v45, %v3386_v45 }
 0x1ed   :  { %v2159_v37 = vadd.f32 %v2158_v5, %v2032_v25  ;;  %v1899_v60 = vadd.f32 %v1898_v1, %v2978_v62  ;;  %v2037_v62 = vmul.f32 %v2998_v54, %v2998_v54  ;;  %v3387_v25 = vld [vmem:[#allocation20_spill] sm:$0xff] }
 0x1ee   :  { %v2051_v1 = vmul.f32 %v3387_v25, %v3387_v25 }
 0x1ef   :  { %v1900_v41 = vadd.f32 %v1899_v60, %v2992_v34  ;;  %v2160_v24 = vadd.f32 %v2159_v37, %v2033_v15  ;;  %v2038_v34 = vmul.f32 %v3012_v30, %v3012_v30  ;;  %v3388_v37 = vld [vmem:[#allocation23_spill] sm:$0xff] }
 0x1f0   :  { %v2052_v60 = vmul.f32 %v3388_v37, %v3388_v37 }
 0x1f1   :  { %v2161_v18 = vadd.f32 %v2160_v24, %v2034_v48  ;;  %v1901_v43 = vadd.f32 %v1900_v41, %v2988_v27  ;;  %v2039_v27 = vmul.f32 %v3008_v17, %v3008_v17  ;;  %v3389_v24 = vld [vmem:[#allocation22_spill] sm:$0xff] }
 0x1f3   :  { %v1902_v52 = vadd.f32 %v1901_v43, %v3002_v61  ;;  %v2162_v12 = vadd.f32 %v2161_v18, %v2035_v40  ;;  %v2040_v61 = vmul.f32 %v3022_v59, %v3022_v59  ;;  %v2053_v40 = vmul.f32 %v3389_v24, %v3389_v24 }
 0x1f5   :  { %v2163_v14 = vadd.f32 %v2162_v12, %v2036_v9  ;;  %v1903_v23 = vadd.f32 %v1902_v52, %v2998_v54  ;;  %v2041_v54 = vmul.f32 %v3018_v49, %v3018_v49  ;;  %v3390_v9 = vld [vmem:[#allocation25_spill] sm:$0xff] }
 0x1f6   :  { %v2054_v52 = vmul.f32 %v3390_v9, %v3390_v9 }
 0x1f7   :  { %v1904_v35 = vadd.f32 %v1903_v23, %v3012_v30  ;;  %v2164_v7 = vadd.f32 %v2163_v14, %v2037_v62  ;;  %v2042_v30 = vmul.f32 %v3032_v33, %v3032_v33  ;;  %v3391_v14 = vld [vmem:[#allocation24_spill] sm:$0xff] }
 0x1f8   :  { %v2055_v23 = vmul.f32 %v3391_v14, %v3391_v14 }
 0x1f9   :  { %v2165_v32 = vadd.f32 %v2164_v7, %v2038_v34  ;;  %v1905_v29 = vadd.f32 %v1904_v35, %v3008_v17  ;;  %v2043_v17 = vmul.f32 %v3028_v20, %v3028_v20  ;;  %v3392_v7 = vld [vmem:[#allocation27_spill] sm:$0xff] }
 0x1fb   :  { %v1906_v22 = vadd.f32 %v1905_v29, %v3022_v59  ;;  %v2166_v2 = vadd.f32 %v2165_v32, %v2039_v27  ;;  %v3380_v59 = vld [vmem:[#allocation15_spill] sm:$0xff]  ;;  %v2056_v27 = vmul.f32 %v3392_v7, %v3392_v7 }
 0x1fc   :  { %v2044_v6 = vmul.f32 %v3380_v59, %v3380_v59 }
 0x1fd   :  { %v2167_v53 = vadd.f32 %v2166_v2, %v2040_v61  ;;  %v1907_v56 = vadd.f32 %v1906_v22, %v3018_v49  ;;  %v2045_v49 = vmul.f32 %v3381_v63, %v3381_v63  ;;  %v3393_v61 = vld [vmem:[#allocation26_spill] sm:$0xff] }
 0x1fe   :  { %v2057_v22 = vmul.f32 %v3393_v61, %v3393_v61 }
 0x1ff   :  { %v1908_v11 = vadd.f32 %v1907_v56, %v3032_v33  ;;  %v2168_v46 = vadd.f32 %v2167_v53, %v2041_v54  ;;  %v3382_v33 = vld [vmem:[#allocation17_spill] sm:$0xff] }
 0x200   :  { %v2046_v26 = vmul.f32 %v3382_v33, %v3382_v33  ;;  %v3394_v53 = vld [vmem:[#allocation29_spill] sm:$0xff] }
 0x201   :  { %v2169_v21 = vadd.f32 %v2168_v46, %v2042_v30  ;;  %v1909_v42 = vadd.f32 %v1908_v11, %v3028_v20  ;;  %v2047_v20 = vmul.f32 %v3383_v19, %v3383_v19  ;;  %v2058_v56 = vmul.f32 %v3394_v53, %v3394_v53  ;;  %v3395_v46 = vld [vmem:[#allocation28_spill] sm:$0xff] }
 0x203   :  { %v1910_v4 = vadd.f32 %v1909_v42, %v3380_v59  ;;  %v2170_v16 = vadd.f32 %v2169_v21, %v2043_v17  ;;  %v2059_v17 = vmul.f32 %v3395_v46, %v3395_v46  ;;  %v3396_v59 = vld [vmem:[#allocation31_spill] sm:$0xff] }
 0x205   :  { %v2171_v51 = vadd.f32 %v2170_v16, %v2044_v6  ;;  %v1911_v8 = vadd.f32 %v1910_v4, %v3381_v63  ;;  %v2060_v6 = vmul.f32 %v3396_v59, %v3396_v59  ;;  %v3397_v63 = vld [vmem:[#allocation30_spill] sm:$0xff] }
 0x207   :  { %v1912_v36 = vadd.f32 %v1911_v8, %v3382_v33  ;;  %v2172_v47 = vadd.f32 %v2171_v51, %v2045_v49  ;;  %v2061_v49 = vmul.f32 %v3397_v63, %v3397_v63 }
 0x209   :  { %v2173_v10 = vadd.f32 %v2172_v47, %v2046_v26  ;;  %v1913_v31 = vadd.f32 %v1912_v36, %v3383_v19 }
 0x20b   :  { %v1914_v57 = vadd.f32 %v1913_v31, %v3384_v44  ;;  %v2174_v39 = vadd.f32 %v2173_v10, %v2047_v20 }
 0x20d   :  { %v2175_v3 = vadd.f32 %v2174_v39, %v2048_v13  ;;  %v1915_v0 = vadd.f32 %v1914_v57, %v3385_v50 }
 0x20f   :  { %v1916_v38 = vadd.f32 %v1915_v0, %v3386_v45  ;;  %v2176_v28 = vadd.f32 %v2175_v3, %v2049_v55 }
 0x211   :  { %v2177_v5 = vadd.f32 %v2176_v28, %v2050_v58  ;;  %v1917_v15 = vadd.f32 %v1916_v38, %v3387_v25 }
 0x213   :  { %v1918_v48 = vadd.f32 %v1917_v15, %v3388_v37  ;;  %v2178_v41 = vadd.f32 %v2177_v5, %v2051_v1 }
 0x215   :  { %v2179_v18 = vadd.f32 %v2178_v41, %v2052_v60  ;;  %v1919_v43 = vadd.f32 %v1918_v48, %v3389_v24 }
 0x217   :  { %v1920_v12 = vadd.f32 %v1919_v43, %v3390_v9  ;;  %v2180_v62 = vadd.f32 %v2179_v18, %v2053_v40 }
 0x219   :  { %v2181_v34 = vadd.f32 %v2180_v62, %v2054_v52  ;;  %v1921_v35 = vadd.f32 %v1920_v12, %v3391_v14 }
 0x21b   :  { %v1922_v32 = vadd.f32 %v1921_v35, %v3392_v7  ;;  %v2182_v29 = vadd.f32 %v2181_v34, %v2055_v23 }
 0x21d   :  { %v2183_v2 = vadd.f32 %v2182_v29, %v2056_v27  ;;  %v1923_v54 = vadd.f32 %v1922_v32, %v3393_v61 }
 0x21f   :  { %v1924_v30 = vadd.f32 %v1923_v54, %v3394_v53  ;;  %v2184_v11 = vadd.f32 %v2183_v2, %v2057_v22 }
 0x221   :  { %v2185_v21 = vadd.f32 %v2184_v11, %v2058_v56  ;;  %v1925_v42 = vadd.f32 %v1924_v30, %v3395_v46 }
 0x223   :  { %v1926_v4 = vadd.f32 %v1925_v42, %v3396_v59  ;;  %v2186_v16 = vadd.f32 %v2185_v21, %v2059_v17 }
 0x225   :  { %v1927_v51 = vadd.f32 %v1926_v4, %v3397_v63  ;;  %v2187_v8 = vadd.f32 %v2186_v16, %v2060_v6 }
 0x227   :  { %v1928_v33 = vrot.slane %v1927_v51, 4  ;;  %v2188_v26 = vadd.f32 %v2187_v8, %v2061_v49 }
 0x229   :  { %v1929_v36 = vadd.f32 %v1928_v33, %v1927_v51  ;;  %v2189_v47 = vrot.slane %v2188_v26, 4 }
 0x22b   :  { %v1930_v19 = vrot.slane %v1929_v36, 2  ;;  %v2190_v20 = vadd.f32 %v2189_v47, %v2188_v26 }
 0x22d   :  { %v1931_v10 = vadd.f32 %v1930_v19, %v1929_v36  ;;  %v2191_v31 = vrot.slane %v2190_v20, 2 }
 0x22f   :  { %v1932_v44 = vrot.slane %v1931_v10, 1  ;;  %v2192_v13 = vadd.f32 %v2191_v31, %v2190_v20 }
 0x231   :  { %v2193_v57 = vrot.slane %v2192_v13, 1  ;;  %v1933_v39 = vadd.f32 %v1932_v44, %v1931_v10 }
 0x233   :  { %v2194_v50 = vadd.f32 %v2193_v57, %v2192_v13 }
 0x235   :  { %v2196_v55 = vsel %vm2195_vm0, %v1933_v39, %v2194_v50 }
 0x236   :  { %2197 = vst [vmem:[#allocation8] sm:$0x3] %v2196_v55 }
 0x237   :  { %2736 = shalt.err (!%p2733_p0)
}
 0x238   :  { %s2737_s6 = scalar_lea.hbm %s3325_s4, 32 }
 0x239   :  { %p2738_p1 = scmp.ne.s32.totalorder %s3325_s4, %s2737_s6  ;;  %p2741_p2 = scmp.lt.u32.totalorder %s2737_s6, %s3325_s4 }
 0x23b   :  { %p2743_p3 = pnand %p2741_p2, %p2738_p1 }
 0x23d   :  { %2746 = shalt.err (!%p2743_p3)
}
 0x23e   :  { %2219 = dma.vmem_to_hbm [thread:$0]  %s2217_s25, 32, %s3325_s4, [#allocation9]  }
 0x23f   :  { %2751 = dma.done.wait [#allocation4], 16384  }
 0x240   :  { %2752 = vsyncadd [#allocation4], 4294950912 }
 0x241   :  { %2753 = dma.done.wait [#allocation9], 32  }
 0x242   :  { %2754 = vsyncadd [#allocation9], 4294967264 }
 0x243   :  { %2226 = vsyncpa [#allocation3], 1 }
 0x244   :  { %2227 = vsyncpa [#allocation6], 1 }
 0x245   :  { %2228 = vsyncpa [#allocation4], 1 }
 0x246   :  { %2229 = vsyncpa [#allocation9], 1 }

</bundles_post_ra>
